<compile_context>
chip_gen: v6e
topology: v6e:2x2x1
jax: 0.10.0
libtpu: 0.0.40
codegen_flags: <defaults>
</compile_context>

<pallas_src>
import functools

import jax
import jax.numpy as jnp
from jax.experimental import pallas as pl
from jax.experimental.pallas import tpu as pltpu

_VMEM_LIMIT = 48 * 1024 * 1024  # explicit scoped-VMEM budget (fits v5e/v6e/v7x)


# ---------------------------------------------------------------------------
# Stage A: input affine + fc1 (+bn1 folded) + tanh                (row-grid)
# ---------------------------------------------------------------------------
def _ff_pre_kernel(x_ref, mean_ref, scale_ref, w1_ref, b1_ref, h_ref):
    xin = (x_ref[...] + mean_ref[...]) * scale_ref[...]
    z = jnp.dot(xin.astype(jnp.bfloat16), w1_ref[...],
                preferred_element_type=jnp.float32)
    h_ref[...] = jnp.tanh(z + b1_ref[...])


# ---------------------------------------------------------------------------
# Stage B1: per-layer LSTM input projection (hoisted out of the recurrence)
# ---------------------------------------------------------------------------
def _lstm_proj_kernel(a_ref, b_ref,
                      w_af_ref, w_bf_ref, bias_f_ref,
                      w_ab_ref, w_bb_ref, bias_b_ref,
                      gf_ref, gb_ref):
    a = a_ref[...].astype(jnp.bfloat16)
    b = b_ref[...].astype(jnp.bfloat16)
    gf_ref[...] = (jnp.dot(a, w_af_ref[...], preferred_element_type=jnp.float32)
                   + jnp.dot(b, w_bf_ref[...], preferred_element_type=jnp.float32)
                   + bias_f_ref[...])
    gb_ref[...] = (jnp.dot(a, w_ab_ref[...], preferred_element_type=jnp.float32)
                   + jnp.dot(b, w_bb_ref[...], preferred_element_type=jnp.float32)
                   + bias_b_ref[...])


# ---------------------------------------------------------------------------
# Stage B2: bidirectional recurrence over frames (sequential grid)
# ---------------------------------------------------------------------------
def _make_lstm_recurrence_kernel(hl):
    HL = hl

    def kernel(gin_f_ref, gin_b_ref, whh_f_ref, whh_b_ref,
               out_f_ref, out_b_ref,
               hf_ref, cf_ref, hb_ref, cb_ref):
        t = pl.program_id(0)

        @pl.when(t == 0)
        def _init():
            hf_ref[...] = jnp.zeros_like(hf_ref)
            cf_ref[...] = jnp.zeros_like(cf_ref)
            hb_ref[...] = jnp.zeros_like(hb_ref)
            cb_ref[...] = jnp.zeros_like(cb_ref)

        def cell(g, c):
            # PyTorch gate order: i, f, g, o
            i_g = jax.nn.sigmoid(g[:, 0 * HL:1 * HL])
            f_g = jax.nn.sigmoid(g[:, 1 * HL:2 * HL])
            g_g = jnp.tanh(g[:, 2 * HL:3 * HL])
            o_g = jax.nn.sigmoid(g[:, 3 * HL:4 * HL])
            c_new = f_g * c + i_g * g_g
            return o_g * jnp.tanh(c_new), c_new

        g_f = gin_f_ref[0] + jnp.dot(hf_ref[...].astype(jnp.bfloat16),
                                     whh_f_ref[...],
                                     preferred_element_type=jnp.float32)
        g_b = gin_b_ref[0] + jnp.dot(hb_ref[...].astype(jnp.bfloat16),
                                     whh_b_ref[...],
                                     preferred_element_type=jnp.float32)
        h_f, c_f = cell(g_f, cf_ref[...])
        h_b, c_b = cell(g_b, cb_ref[...])
        hf_ref[...] = h_f
        cf_ref[...] = c_f
        hb_ref[...] = h_b
        cb_ref[...] = c_b
        out_f_ref[0] = h_f
        out_b_ref[0] = h_b

    return kernel


# ---------------------------------------------------------------------------
# Stage C: skip connection + fc2/fc3 (+ output affine) + mtl head  (row-grid)
# ---------------------------------------------------------------------------
def _ff_post_kernel(h_ref, lf_ref, lb_ref, mix_ref,
                    w2h_ref, w2f_ref, w2b_ref, b2_ref,
                    w3_ref, b3_ref,
                    w4h_ref, w4f_ref, w4b_ref, b4_ref,
                    w5_ref, b5_ref,
                    x_out_ref, y_out_ref):
    h = h_ref[...].astype(jnp.bfloat16)
    lf = lf_ref[...].astype(jnp.bfloat16)
    lb = lb_ref[...].astype(jnp.bfloat16)

    # cat([h, lstm_fwd, lstm_bwd]) @ W realised as row-split matmuls.
    z2 = (jnp.dot(h, w2h_ref[...], preferred_element_type=jnp.float32)
          + jnp.dot(lf, w2f_ref[...], preferred_element_type=jnp.float32)
          + jnp.dot(lb, w2b_ref[...], preferred_element_type=jnp.float32)
          + b2_ref[...])
    z2 = jnp.maximum(z2, 0.0)
    xo = jnp.dot(z2.astype(jnp.bfloat16), w3_ref[...],
                 preferred_element_type=jnp.float32) + b3_ref[...]
    x_out_ref[...] = jnp.maximum(xo, 0.0) * mix_ref[...]

    # mtl head: fc4(+bn4) -> relu -> fc5(+bn5) -> sigmoid
    z4 = (jnp.dot(h, w4h_ref[...], preferred_element_type=jnp.float32)
          + jnp.dot(lf, w4f_ref[...], preferred_element_type=jnp.float32)
          + jnp.dot(lb, w4b_ref[...], preferred_element_type=jnp.float32)
          + b4_ref[...])
    z4 = jnp.maximum(z4, 0.0)
    yv = jnp.sum(z4 * w5_ref[...], axis=-1, keepdims=True) + b5_ref[...]
    y_out_ref[...] = jax.nn.sigmoid(yv)


# ---------------------------------------------------------------------------
# Host wrapper
# ---------------------------------------------------------------------------
def _bn_fold(params, name, eps=1e-5):
    s = params[f"{name}_gamma"] / jnp.sqrt(params[f"{name}_var"] + eps)
    return s, params[f"{name}_beta"] - params[f"{name}_mean"] * s


@functools.partial(jax.jit, static_argnames=("hidden_size", "nb_layers", "row_tile"))
def openunmix_mtl_forward(x, params, *, hidden_size=32, nb_layers=3, row_tile=8):
    """x: (nb_frames, nb_samples, nb_channels, nb_bins) magnitude spectrogram.

    Returns (mask_spec, y) matching OpenUnmix_mtl.forward (eval mode):
      mask_spec: (nb_frames, nb_samples, nb_channels, nb_output_bins)
      y:         (nb_samples, nb_frames, 1)
    """
    F, S, C, B = x.shape
    nb_out = B                      # max_bin=None -> nb_bins == nb_output_bins
    H = hidden_size
    HL = H // 2                     # bidirectional LSTM hidden per direction
    H2 = H // 2                     # fc4 output width
    R = F * S
    CB = C * B
    Fp = ((CB + 127) // 128) * 128  # lane-dense padded feature width
    bf = jnp.bfloat16

    # ---- fold BatchNorm (eval) into the adjacent matmul weights ------------
    s1, o1 = _bn_fold(params, "bn1")
    s2, o2 = _bn_fold(params, "bn2")
    s3, o3 = _bn_fold(params, "bn3")
    s4, o4 = _bn_fold(params, "bn4")
    s5, o5 = _bn_fold(params, "bn5")

    tileC = lambda v: jnp.tile(v, C)                 # per-bin -> per (C*B) column
    padF = lambda v: jnp.pad(v, (0, Fp - CB))

    x_flat = x.reshape(R, CB).astype(jnp.float32)
    mix_pad = jnp.pad(x_flat, ((0, 0), (0, Fp - CB)))      # original spectrogram

    in_mean = padF(tileC(params["input_mean"]))[None, :]
    in_scale = padF(tileC(params["input_scale"]))[None, :]

    w1 = params["fc1_w"].T * s1[None, :]                    # (CB, H)
    w1 = jnp.pad(w1, ((0, Fp - CB), (0, 0))).astype(bf)
    b1 = o1[None, :]

    w2 = params["fc2_w"].T * s2[None, :]                    # (2H, H)
    w2h, w2f, w2b = (w2[:H].astype(bf), w2[H:H + HL].astype(bf),
                     w2[H + HL:].astype(bf))
    b2 = o2[None, :]

    os_t, om_t = tileC(params["output_scale"]), tileC(params["output_mean"])
    w3 = params["fc3_w"].T * (s3 * os_t)[None, :]            # (H, C*nb_out)
    w3 = jnp.pad(w3, ((0, 0), (0, Fp - CB))).astype(bf)
    b3 = padF(o3 * os_t + om_t)[None, :]

    w4 = params["fc4_w"].T * s4[None, :]                     # (2H, H2)
    w4h, w4f, w4b = (w4[:H].astype(bf), w4[H:H + HL].astype(bf),
                     w4[H + HL:].astype(bf))
    b4 = o4[None, :]

    w5 = params["fc5_w"] * s5[:, None]                       # (1, H2), f32
    b5 = o5.reshape(1, 1)

    TR = row_tile if (row_tile and R % row_tile == 0 and row_tile % 8 == 0) else R
    grid = (R // TR,)
    ff_params = pltpu.CompilerParams(dimension_semantics=("parallel",),
                                     vmem_limit_bytes=_VMEM_LIMIT)
    seq_params = pltpu.CompilerParams(dimension_semantics=("arbitrary",),
                                      vmem_limit_bytes=_VMEM_LIMIT)

    # ---- stage A ------------------------------------------------------------
    h = pl.pallas_call(
        _ff_pre_kernel,
        out_shape=jax.ShapeDtypeStruct((R, H), jnp.float32),
        grid=grid,
        in_specs=[
            pl.BlockSpec((TR, Fp), lambda i: (i, 0)),
            pl.BlockSpec((1, Fp), lambda i: (0, 0)),
            pl.BlockSpec((1, Fp), lambda i: (0, 0)),
            pl.BlockSpec((Fp, H), lambda i: (0, 0)),    # weights stay resident
            pl.BlockSpec((1, H), lambda i: (0, 0)),
        ],
        out_specs=pl.BlockSpec((TR, H), lambda i: (i, 0)),
        compiler_params=ff_params,
    )(mix_pad, in_mean, in_scale, w1, b1)

    # ---- stage B: 3-layer bidirectional LSTM --------------------------------
    recur_kernel = _make_lstm_recurrence_kernel(HL)
    a2d, b2d = h[:, :HL], h[:, HL:]          # layer-0 input split into halves
    for layer in range(nb_layers):
        w_ih = params["lstm_w_ih"][layer]    # (2, 4HL, H)   torch layout
        w_hh = params["lstm_w_hh"][layer]    # (2, 4HL, HL)
        bias = params["lstm_b_ih"][layer] + params["lstm_b_hh"][layer]  # (2, 4HL)

        wt_f, wt_b = w_ih[0].T, w_ih[1].T                   # (H, 4HL)
        w_af, w_bf = wt_f[:HL].astype(bf), wt_f[HL:].astype(bf)
        w_ab, w_bb = wt_b[:HL].astype(bf), wt_b[HL:].astype(bf)
        whh_f, whh_b = w_hh[0].T.astype(bf), w_hh[1].T.astype(bf)   # (HL, 4HL)
        bias_f, bias_b = bias[0][None, :], bias[1][None, :]

        # B1: hoisted input projection for all timesteps (both directions)
        gin_f, gin_b = pl.pallas_call(
            _lstm_proj_kernel,
            out_shape=(jax.ShapeDtypeStruct((R, 4 * HL), jnp.float32),
                       jax.ShapeDtypeStruct((R, 4 * HL), jnp.float32)),
            grid=grid,
            in_specs=[
                pl.BlockSpec((TR, HL), lambda i: (i, 0)),
                pl.BlockSpec((TR, HL), lambda i: (i, 0)),
                pl.BlockSpec((HL, 4 * HL), lambda i: (0, 0)),
                pl.BlockSpec((HL, 4 * HL), lambda i: (0, 0)),
                pl.BlockSpec((1, 4 * HL), lambda i: (0, 0)),
                pl.BlockSpec((HL, 4 * HL), lambda i: (0, 0)),
                pl.BlockSpec((HL, 4 * HL), lambda i: (0, 0)),
                pl.BlockSpec((1, 4 * HL), lambda i: (0, 0)),
            ],
            out_specs=(pl.BlockSpec((TR, 4 * HL), lambda i: (i, 0)),
                       pl.BlockSpec((TR, 4 * HL), lambda i: (i, 0))),
            compiler_params=ff_params,
        )(a2d, b2d, w_af, w_bf, bias_f, w_ab, w_bb, bias_b)

        gin_f3 = gin_f.reshape(F, S, 4 * HL)
        gin_b3 = gin_b.reshape(F, S, 4 * HL)

        # B2: fused fwd/bwd recurrence over the frame grid
        out_f, out_b = pl.pallas_call(
            recur_kernel,
            out_shape=(jax.ShapeDtypeStruct((F, S, HL), jnp.float32),
                       jax.ShapeDtypeStruct((F, S, HL), jnp.float32)),
            grid=(F,),
            in_specs=[
                pl.BlockSpec((1, S, 4 * HL), lambda t: (t, 0, 0)),
                pl.BlockSpec((1, S, 4 * HL), lambda t: (F - 1 - t, 0, 0)),
                pl.BlockSpec((HL, 4 * HL), lambda t: (0, 0)),
                pl.BlockSpec((HL, 4 * HL), lambda t: (0, 0)),
            ],
            out_specs=(pl.BlockSpec((1, S, HL), lambda t: (t, 0, 0)),
                       pl.BlockSpec((1, S, HL), lambda t: (F - 1 - t, 0, 0))),
            scratch_shapes=[pltpu.VMEM((S, HL), jnp.float32),
                            pltpu.VMEM((S, HL), jnp.float32),
                            pltpu.VMEM((S, HL), jnp.float32),
                            pltpu.VMEM((S, HL), jnp.float32)],
            compiler_params=seq_params,
        )(gin_f3, gin_b3, whh_f, whh_b)

        a2d = out_f.reshape(R, HL)
        b2d = out_b.reshape(R, HL)

    # ---- stage C ------------------------------------------------------------
    x_out, y_out = pl.pallas_call(
        _ff_post_kernel,
        out_shape=(jax.ShapeDtypeStruct((R, Fp), jnp.float32),
                   jax.ShapeDtypeStruct((R, 1), jnp.float32)),
        grid=grid,
        in_specs=[
            pl.BlockSpec((TR, H), lambda i: (i, 0)),     # h (skip branch)
            pl.BlockSpec((TR, HL), lambda i: (i, 0)),    # lstm fwd
            pl.BlockSpec((TR, HL), lambda i: (i, 0)),    # lstm bwd
            pl.BlockSpec((TR, Fp), lambda i: (i, 0)),    # mix
            pl.BlockSpec((H, H), lambda i: (0, 0)),
            pl.BlockSpec((HL, H), lambda i: (0, 0)),
            pl.BlockSpec((HL, H), lambda i: (0, 0)),
            pl.BlockSpec((1, H), lambda i: (0, 0)),
            pl.BlockSpec((H, Fp), lambda i: (0, 0)),
            pl.BlockSpec((1, Fp), lambda i: (0, 0)),
            pl.BlockSpec((H, H2), lambda i: (0, 0)),
            pl.BlockSpec((HL, H2), lambda i: (0, 0)),
            pl.BlockSpec((HL, H2), lambda i: (0, 0)),
            pl.BlockSpec((1, H2), lambda i: (0, 0)),
            pl.BlockSpec((1, H2), lambda i: (0, 0)),
            pl.BlockSpec((1, 1), lambda i: (0, 0)),
        ],
        out_specs=(pl.BlockSpec((TR, Fp), lambda i: (i, 0)),
                   pl.BlockSpec((TR, 1), lambda i: (i, 0))),
        compiler_params=ff_params,
    )(h, a2d, b2d, mix_pad,
      w2h, w2f, w2b, b2, w3, b3, w4h, w4f, w4b, b4, w5, b5)

    x_spec = x_out[:, :CB].reshape(F, S, C, nb_out)
    y_mtl = y_out.reshape(S, F, 1)   # mirrors torch's .reshape(nb_samples, nb_frames, 1)
    return x_spec, y_mtl


# ---------------------------------------------------------------------------
# Deterministic synthetic parameters (torch layouts)
# ---------------------------------------------------------------------------
def init_params(key, *, nb_bins=16, hidden_size=32, nb_channels=2, nb_layers=3):
    H = hidden_size
    HL = H // 2
    H2 = H // 2
    nb_out = nb_bins
    keys = iter(jax.random.split(key, 64))

    def u(shape, s=0.3):
        return jax.random.uniform(next(keys), shape, jnp.float32, -s, s)

    p = {
        "input_mean": u((nb_bins,), 0.1),
        "input_scale": 1.0 + u((nb_bins,), 0.1),
        "output_scale": 1.0 + u((nb_out,), 0.1),
        "output_mean": u((nb_out,), 0.1),
        "fc1_w": u((H, nb_bins * nb_channels)),       # torch Linear: (out, in)
        "fc2_w": u((H, 2 * H)),
        "fc3_w": u((nb_out * nb_channels, H)),
        "fc4_w": u((H2, 2 * H)),
        "fc5_w": u((1, H2)),
    }
    for i, n in [(1, H), (2, H), (3, nb_out * nb_channels), (4, H2), (5, 1)]:
        p[f"bn{i}_gamma"] = 1.0 + u((n,), 0.1)
        p[f"bn{i}_beta"] = u((n,), 0.1)
        p[f"bn{i}_mean"] = u((n,), 0.1)
        p[f"bn{i}_var"] = 1.0 + u((n,), 0.1)

    p["lstm_w_ih"] = u((nb_layers, 2, 4 * HL, H))     # weight_ih_l{k}[_reverse]
    p["lstm_w_hh"] = u((nb_layers, 2, 4 * HL, HL))
    p["lstm_b_ih"] = u((nb_layers, 2, 4 * HL))
    p["lstm_b_hh"] = u((nb_layers, 2, 4 * HL))
    return p


if __name__ == "__main__":
    key = jax.random.PRNGKey(0)
    kx, kp = jax.random.split(key)

    # small shapes (as if n_fft=30 -> nb_bins = 16)
    F, S, C, nb_bins = 16, 2, 2, 16
    hidden, layers = 32, 3

    params = init_params(kp, nb_bins=nb_bins, hidden_size=hidden,
                         nb_channels=C, nb_layers=layers)
    x = jax.random.uniform(kx, (F, S, C, nb_bins), jnp.float32, 0.0, 1.0)

    x_spec, y_mtl = openunmix_mtl_forward(x, params, hidden_size=hidden,
                                          nb_layers=layers, row_tile=8)
    x_spec, y_mtl = jax.block_until_ready((x_spec, y_mtl))

    assert x_spec.shape == (F, S, C, nb_bins), x_spec.shape
    assert y_mtl.shape == (S, F, 1), y_mtl.shape
    assert bool(jnp.all(jnp.isfinite(x_spec)))
    assert bool(jnp.all(jnp.isfinite(y_mtl)))
    print("KERNEL_OK")
</pallas_src>

<mosaic_0001>
module attributes {stable_mosaic.version = 11 : i64} {
  func.func @_ff_pre_kernel(%arg0: i32, %arg1: memref<8x128xf32, #tpu.memory_space<vmem>>, %arg2: memref<1x128xf32, #tpu.memory_space<vmem>>, %arg3: memref<1x128xf32, #tpu.memory_space<vmem>>, %arg4: memref<128x32xbf16, #tpu.memory_space<vmem>>, %arg5: memref<1x32xf32, #tpu.memory_space<vmem>>, %arg6: memref<8x32xf32, #tpu.memory_space<vmem>>) attributes {dimension_semantics = [#tpu.dimension_semantics<parallel>], iteration_bounds = array<i64: 4>, scalar_prefetch = 0 : i64, scratch_operands = 0 : i64, tpu.core_type = #tpu.core_type<tc>, window_params = [{transform_indices = @transform_0, window_bounds = array<i64: 8, 128>}, {pipeline_mode = #tpu.pipeline_mode<synchronous>, transform_indices = @transform_1, window_bounds = array<i64: 1, 128>}, {pipeline_mode = #tpu.pipeline_mode<synchronous>, transform_indices = @transform_2, window_bounds = array<i64: 1, 128>}, {pipeline_mode = #tpu.pipeline_mode<synchronous>, transform_indices = @transform_3, window_bounds = array<i64: 128, 32>}, {pipeline_mode = #tpu.pipeline_mode<synchronous>, transform_indices = @transform_4, window_bounds = array<i64: 1, 32>}, {transform_indices = @transform_5, window_bounds = array<i64: 8, 32>}]} {
    %c0 = arith.constant 0 : index
    %c0_0 = arith.constant 0 : index
    %0 = vector.load %arg1[%c0, %c0_0] : memref<8x128xf32, #tpu.memory_space<vmem>>, vector<8x128xf32>
    %c0_1 = arith.constant 0 : index
    %c0_2 = arith.constant 0 : index
    %1 = vector.load %arg2[%c0_1, %c0_2] : memref<1x128xf32, #tpu.memory_space<vmem>>, vector<1x128xf32>
    %2 = vector.broadcast %1 : vector<1x128xf32> to vector<8x128xf32>
    %3 = arith.addf %0, %2 : vector<8x128xf32>
    %c0_3 = arith.constant 0 : index
    %c0_4 = arith.constant 0 : index
    %4 = vector.load %arg3[%c0_3, %c0_4] : memref<1x128xf32, #tpu.memory_space<vmem>>, vector<1x128xf32>
    %5 = vector.broadcast %4 : vector<1x128xf32> to vector<8x128xf32>
    %6 = arith.mulf %3, %5 : vector<8x128xf32>
    %7 = arith.truncf %6 : vector<8x128xf32> to vector<8x128xbf16>
    %c0_5 = arith.constant 0 : index
    %c0_6 = arith.constant 0 : index
    %8 = vector.load %arg4[%c0_5, %c0_6] : memref<128x32xbf16, #tpu.memory_space<vmem>>, vector<128x32xbf16>
    %cst = arith.constant dense<0.000000e+00> : vector<8x32xf32>
    %9 = tpu.matmul %7, %8, %cst {dimension_numbers = #tpu.dot_dimension_numbers<[1], [0], [0], [1], [0, 0, 1, 1], [], []>} : vector<8x128xbf16>, vector<128x32xbf16>, vector<8x32xf32> -> vector<8x32xf32>
    %c0_7 = arith.constant 0 : index
    %c0_8 = arith.constant 0 : index
    %10 = vector.load %arg5[%c0_7, %c0_8] : memref<1x32xf32, #tpu.memory_space<vmem>>, vector<1x32xf32>
    %11 = vector.broadcast %10 : vector<1x32xf32> to vector<8x32xf32>
    %12 = arith.addf %9, %11 : vector<8x32xf32>
    %13 = math.tanh %12 : vector<8x32xf32>
    %c0_9 = arith.constant 0 : index
    %c0_10 = arith.constant 0 : index
    %14 = vector.load %arg6[%c0_9, %c0_10] : memref<8x32xf32, #tpu.memory_space<vmem>>, vector<8x32xf32>
    tpu.vector_store %arg6[%c0_9, %c0_10], %13 {strides = array<i32>} : memref<8x32xf32, #tpu.memory_space<vmem>>, vector<8x32xf32>,
    return
  }
  func.func @transform_0(%arg0: i32) -> (i32, i32) {
    %c0_i32 = arith.constant 0 : i32
    %c0_i32_0 = arith.constant 0 : i32
    return %arg0, %c0_i32 : i32, i32
  }
  func.func @transform_1(%arg0: i32) -> (i32, i32) {
    %c0_i32 = arith.constant 0 : i32
    %c0_i32_0 = arith.constant 0 : i32
    %c0_i32_1 = arith.constant 0 : i32
    return %c0_i32, %c0_i32_0 : i32, i32
  }
  func.func @transform_2(%arg0: i32) -> (i32, i32) {
    %c0_i32 = arith.constant 0 : i32
    %c0_i32_0 = arith.constant 0 : i32
    %c0_i32_1 = arith.constant 0 : i32
    return %c0_i32, %c0_i32_0 : i32, i32
  }
  func.func @transform_3(%arg0: i32) -> (i32, i32) {
    %c0_i32 = arith.constant 0 : i32
    %c0_i32_0 = arith.constant 0 : i32
    %c0_i32_1 = arith.constant 0 : i32
    return %c0_i32, %c0_i32_0 : i32, i32
  }
  func.func @transform_4(%arg0: i32) -> (i32, i32) {
    %c0_i32 = arith.constant 0 : i32
    %c0_i32_0 = arith.constant 0 : i32
    %c0_i32_1 = arith.constant 0 : i32
    return %c0_i32, %c0_i32_0 : i32, i32
  }
  func.func @transform_5(%arg0: i32) -> (i32, i32) {
    %c0_i32 = arith.constant 0 : i32
    %c0_i32_0 = arith.constant 0 : i32
    return %arg0, %c0_i32 : i32, i32
  }
}

module attributes {stable_mosaic.version = 11 : i64} {
  func.func @_lstm_proj_kernel(%arg0: i32, %arg1: memref<8x16xf32, #tpu.memory_space<vmem>>, %arg2: memref<8x16xf32, #tpu.memory_space<vmem>>, %arg3: memref<16x64xbf16, #tpu.memory_space<vmem>>, %arg4: memref<16x64xbf16, #tpu.memory_space<vmem>>, %arg5: memref<1x64xf32, #tpu.memory_space<vmem>>, %arg6: memref<16x64xbf16, #tpu.memory_space<vmem>>, %arg7: memref<16x64xbf16, #tpu.memory_space<vmem>>, %arg8: memref<1x64xf32, #tpu.memory_space<vmem>>, %arg9: memref<8x64xf32, #tpu.memory_space<vmem>>, %arg10: memref<8x64xf32, #tpu.memory_space<vmem>>) attributes {dimension_semantics = [#tpu.dimension_semantics<parallel>], iteration_bounds = array<i64: 4>, scalar_prefetch = 0 : i64, scratch_operands = 0 : i64, tpu.core_type = #tpu.core_type<tc>, window_params = [{transform_indices = @transform_0, window_bounds = array<i64: 8, 16>}, {transform_indices = @transform_1, window_bounds = array<i64: 8, 16>}, {pipeline_mode = #tpu.pipeline_mode<synchronous>, transform_indices = @transform_2, window_bounds = array<i64: 16, 64>}, {pipeline_mode = #tpu.pipeline_mode<synchronous>, transform_indices = @transform_3, window_bounds = array<i64: 16, 64>}, {pipeline_mode = #tpu.pipeline_mode<synchronous>, transform_indices = @transform_4, window_bounds = array<i64: 1, 64>}, {pipeline_mode = #tpu.pipeline_mode<synchronous>, transform_indices = @transform_5, window_bounds = array<i64: 16, 64>}, {pipeline_mode = #tpu.pipeline_mode<synchronous>, transform_indices = @transform_6, window_bounds = array<i64: 16, 64>}, {pipeline_mode = #tpu.pipeline_mode<synchronous>, transform_indices = @transform_7, window_bounds = array<i64: 1, 64>}, {transform_indices = @transform_8, window_bounds = array<i64: 8, 64>}, {transform_indices = @transform_9, window_bounds = array<i64: 8, 64>}]} {
    %c0 = arith.constant 0 : index
    %c0_0 = arith.constant 0 : index
    %0 = vector.load %arg1[%c0, %c0_0] : memref<8x16xf32, #tpu.memory_space<vmem>>, vector<8x16xf32>
    %1 = arith.truncf %0 : vector<8x16xf32> to vector<8x16xbf16>
    %c0_1 = arith.constant 0 : index
    %c0_2 = arith.constant 0 : index
    %2 = vector.load %arg2[%c0_1, %c0_2] : memref<8x16xf32, #tpu.memory_space<vmem>>, vector<8x16xf32>
    %3 = arith.truncf %2 : vector<8x16xf32> to vector<8x16xbf16>
    %c0_3 = arith.constant 0 : index
    %c0_4 = arith.constant 0 : index
    %4 = vector.load %arg3[%c0_3, %c0_4] : memref<16x64xbf16, #tpu.memory_space<vmem>>, vector<16x64xbf16>
    %cst = arith.constant dense<0.000000e+00> : vector<8x64xf32>
    %5 = tpu.matmul %1, %4, %cst {dimension_numbers = #tpu.dot_dimension_numbers<[1], [0], [0], [1], [0, 0, 1, 1], [], []>} : vector<8x16xbf16>, vector<16x64xbf16>, vector<8x64xf32> -> vector<8x64xf32>
    %c0_5 = arith.constant 0 : index
    %c0_6 = arith.constant 0 : index
    %6 = vector.load %arg4[%c0_5, %c0_6] : memref<16x64xbf16, #tpu.memory_space<vmem>>, vector<16x64xbf16>
    %cst_7 = arith.constant dense<0.000000e+00> : vector<8x64xf32>
    %7 = tpu.matmul %3, %6, %cst_7 {dimension_numbers = #tpu.dot_dimension_numbers<[1], [0], [0], [1], [0, 0, 1, 1], [], []>} : vector<8x16xbf16>, vector<16x64xbf16>, vector<8x64xf32> -> vector<8x64xf32>
    %8 = arith.addf %5, %7 : vector<8x64xf32>
    %c0_8 = arith.constant 0 : index
    %c0_9 = arith.constant 0 : index
    %9 = vector.load %arg5[%c0_8, %c0_9] : memref<1x64xf32, #tpu.memory_space<vmem>>, vector<1x64xf32>
    %10 = vector.broadcast %9 : vector<1x64xf32> to vector<8x64xf32>
    %11 = arith.addf %8, %10 : vector<8x64xf32>
    %c0_10 = arith.constant 0 : index
    %c0_11 = arith.constant 0 : index
    %12 = vector.load %arg9[%c0_10, %c0_11] : memref<8x64xf32, #tpu.memory_space<vmem>>, vector<8x64xf32>
    tpu.vector_store %arg9[%c0_10, %c0_11], %11 {strides = array<i32>} : memref<8x64xf32, #tpu.memory_space<vmem>>, vector<8x64xf32>,
    %c0_12 = arith.constant 0 : index
    %c0_13 = arith.constant 0 : index
    %13 = vector.load %arg6[%c0_12, %c0_13] : memref<16x64xbf16, #tpu.memory_space<vmem>>, vector<16x64xbf16>
    %cst_14 = arith.constant dense<0.000000e+00> : vector<8x64xf32>
    %14 = tpu.matmul %1, %13, %cst_14 {dimension_numbers = #tpu.dot_dimension_numbers<[1], [0], [0], [1], [0, 0, 1, 1], [], []>} : vector<8x16xbf16>, vector<16x64xbf16>, vector<8x64xf32> -> vector<8x64xf32>
    %c0_15 = arith.constant 0 : index
    %c0_16 = arith.constant 0 : index
    %15 = vector.load %arg7[%c0_15, %c0_16] : memref<16x64xbf16, #tpu.memory_space<vmem>>, vector<16x64xbf16>
    %cst_17 = arith.constant dense<0.000000e+00> : vector<8x64xf32>
    %16 = tpu.matmul %3, %15, %cst_17 {dimension_numbers = #tpu.dot_dimension_numbers<[1], [0], [0], [1], [0, 0, 1, 1], [], []>} : vector<8x16xbf16>, vector<16x64xbf16>, vector<8x64xf32> -> vector<8x64xf32>
    %17 = arith.addf %14, %16 : vector<8x64xf32>
    %c0_18 = arith.constant 0 : index
    %c0_19 = arith.constant 0 : index
    %18 = vector.load %arg8[%c0_18, %c0_19] : memref<1x64xf32, #tpu.memory_space<vmem>>, vector<1x64xf32>
    %19 = vector.broadcast %18 : vector<1x64xf32> to vector<8x64xf32>
    %20 = arith.addf %17, %19 : vector<8x64xf32>
    %c0_20 = arith.constant 0 : index
    %c0_21 = arith.constant 0 : index
    %21 = vector.load %arg10[%c0_20, %c0_21] : memref<8x64xf32, #tpu.memory_space<vmem>>, vector<8x64xf32>
    tpu.vector_store %arg10[%c0_20, %c0_21], %20 {strides = array<i32>} : memref<8x64xf32, #tpu.memory_space<vmem>>, vector<8x64xf32>,
    return
  }
  func.func @transform_0(%arg0: i32) -> (i32, i32) {
    %c0_i32 = arith.constant 0 : i32
    %c0_i32_0 = arith.constant 0 : i32
    return %arg0, %c0_i32 : i32, i32
  }
  func.func @transform_1(%arg0: i32) -> (i32, i32) {
    %c0_i32 = arith.constant 0 : i32
    %c0_i32_0 = arith.constant 0 : i32
    return %arg0, %c0_i32 : i32, i32
  }
  func.func @transform_2(%arg0: i32) -> (i32, i32) {
    %c0_i32 = arith.constant 0 : i32
    %c0_i32_0 = arith.constant 0 : i32
    %c0_i32_1 = arith.constant 0 : i32
    return %c0_i32, %c0_i32_0 : i32, i32
  }
  func.func @transform_3(%arg0: i32) -> (i32, i32) {
    %c0_i32 = arith.constant 0 : i32
    %c0_i32_0 = arith.constant 0 : i32
    %c0_i32_1 = arith.constant 0 : i32
    return %c0_i32, %c0_i32_0 : i32, i32
  }
  func.func @transform_4(%arg0: i32) -> (i32, i32) {
    %c0_i32 = arith.constant 0 : i32
    %c0_i32_0 = arith.constant 0 : i32
    %c0_i32_1 = arith.constant 0 : i32
    return %c0_i32, %c0_i32_0 : i32, i32
  }
  func.func @transform_5(%arg0: i32) -> (i32, i32) {
    %c0_i32 = arith.constant 0 : i32
    %c0_i32_0 = arith.constant 0 : i32
    %c0_i32_1 = arith.constant 0 : i32
    return %c0_i32, %c0_i32_0 : i32, i32
  }
  func.func @transform_6(%arg0: i32) -> (i32, i32) {
    %c0_i32 = arith.constant 0 : i32
    %c0_i32_0 = arith.constant 0 : i32
    %c0_i32_1 = arith.constant 0 : i32
    return %c0_i32, %c0_i32_0 : i32, i32
  }
  func.func @transform_7(%arg0: i32) -> (i32, i32) {
    %c0_i32 = arith.constant 0 : i32
    %c0_i32_0 = arith.constant 0 : i32
    %c0_i32_1 = arith.constant 0 : i32
    return %c0_i32, %c0_i32_0 : i32, i32
  }
  func.func @transform_8(%arg0: i32) -> (i32, i32) {
    %c0_i32 = arith.constant 0 : i32
    %c0_i32_0 = arith.constant 0 : i32
    return %arg0, %c0_i32 : i32, i32
  }
  func.func @transform_9(%arg0: i32) -> (i32, i32) {
    %c0_i32 = arith.constant 0 : i32
    %c0_i32_0 = arith.constant 0 : i32
    return %arg0, %c0_i32 : i32, i32
  }
}

module attributes {stable_mosaic.version = 11 : i64} {
  func.func @kernel(%arg0: i32, %arg1: memref<1x2x64xf32, #tpu.memory_space<vmem>>, %arg2: memref<1x2x64xf32, #tpu.memory_space<vmem>>, %arg3: memref<16x64xbf16, #tpu.memory_space<vmem>>, %arg4: memref<16x64xbf16, #tpu.memory_space<vmem>>, %arg5: memref<1x2x16xf32, #tpu.memory_space<vmem>>, %arg6: memref<1x2x16xf32, #tpu.memory_space<vmem>>, %arg7: memref<2x16xf32, #tpu.memory_space<vmem>>, %arg8: memref<2x16xf32, #tpu.memory_space<vmem>>, %arg9: memref<2x16xf32, #tpu.memory_space<vmem>>, %arg10: memref<2x16xf32, #tpu.memory_space<vmem>>) attributes {dimension_semantics = [#tpu.dimension_semantics<arbitrary>], iteration_bounds = array<i64: 16>, scalar_prefetch = 0 : i64, scratch_operands = 4 : i64, tpu.core_type = #tpu.core_type<tc>, window_params = [{transform_indices = @transform_0, window_bounds = array<i64: 1, 2, 64>}, {transform_indices = @transform_1, window_bounds = array<i64: 1, 2, 64>}, {pipeline_mode = #tpu.pipeline_mode<synchronous>, transform_indices = @transform_2, window_bounds = array<i64: 16, 64>}, {pipeline_mode = #tpu.pipeline_mode<synchronous>, transform_indices = @transform_3, window_bounds = array<i64: 16, 64>}, {transform_indices = @transform_4, window_bounds = array<i64: 1, 2, 16>}, {transform_indices = @transform_5, window_bounds = array<i64: 1, 2, 16>}]} {
    %c0_i32 = arith.constant 0 : i32
    %0 = arith.cmpi eq, %arg0, %c0_i32 : i32
    %1 = arith.extui %0 : i1 to i32
    %c0_i32_0 = arith.constant 0 : i32
    %2 = arith.cmpi ne, %1, %c0_i32_0 : i32
    scf.if %2 {
      %cst_39 = arith.constant 0.000000e+00 : f32
      %79 = vector.broadcast %cst_39 : f32 to vector<2x16xf32>
      %c0_40 = arith.constant 0 : index
      %c0_41 = arith.constant 0 : index
      %80 = vector.load %arg7[%c0_40, %c0_41] : memref<2x16xf32, #tpu.memory_space<vmem>>, vector<2x16xf32>
      tpu.vector_store %arg7[%c0_40, %c0_41], %79 {strides = array<i32>} : memref<2x16xf32, #tpu.memory_space<vmem>>, vector<2x16xf32>,
      %cst_42 = arith.constant 0.000000e+00 : f32
      %81 = vector.broadcast %cst_42 : f32 to vector<2x16xf32>
      %c0_43 = arith.constant 0 : index
      %c0_44 = arith.constant 0 : index
      %82 = vector.load %arg8[%c0_43, %c0_44] : memref<2x16xf32, #tpu.memory_space<vmem>>, vector<2x16xf32>
      tpu.vector_store %arg8[%c0_43, %c0_44], %81 {strides = array<i32>} : memref<2x16xf32, #tpu.memory_space<vmem>>, vector<2x16xf32>,
      %cst_45 = arith.constant 0.000000e+00 : f32
      %83 = vector.broadcast %cst_45 : f32 to vector<2x16xf32>
      %c0_46 = arith.constant 0 : index
      %c0_47 = arith.constant 0 : index
      %84 = vector.load %arg9[%c0_46, %c0_47] : memref<2x16xf32, #tpu.memory_space<vmem>>, vector<2x16xf32>
      tpu.vector_store %arg9[%c0_46, %c0_47], %83 {strides = array<i32>} : memref<2x16xf32, #tpu.memory_space<vmem>>, vector<2x16xf32>,
      %cst_48 = arith.constant 0.000000e+00 : f32
      %85 = vector.broadcast %cst_48 : f32 to vector<2x16xf32>
      %c0_49 = arith.constant 0 : index
      %c0_50 = arith.constant 0 : index
      %86 = vector.load %arg10[%c0_49, %c0_50] : memref<2x16xf32, #tpu.memory_space<vmem>>, vector<2x16xf32>
      tpu.vector_store %arg10[%c0_49, %c0_50], %85 {strides = array<i32>} : memref<2x16xf32, #tpu.memory_space<vmem>>, vector<2x16xf32>,
    } else {
    }
    %c0 = arith.constant 0 : index
    %c0_1 = arith.constant 0 : index
    %c0_2 = arith.constant 0 : index
    %3 = vector.load %arg1[%c0, %c0_1, %c0_2] : memref<1x2x64xf32, #tpu.memory_space<vmem>>, vector<1x2x64xf32>
    %4 = vector.shape_cast %3 : vector<1x2x64xf32> to vector<2x64xf32>
    %c0_3 = arith.constant 0 : index
    %c0_4 = arith.constant 0 : index
    %5 = vector.load %arg7[%c0_3, %c0_4] : memref<2x16xf32, #tpu.memory_space<vmem>>, vector<2x16xf32>
    %6 = arith.truncf %5 : vector<2x16xf32> to vector<2x16xbf16>
    %c0_5 = arith.constant 0 : index
    %c0_6 = arith.constant 0 : index
    %7 = vector.load %arg3[%c0_5, %c0_6] : memref<16x64xbf16, #tpu.memory_space<vmem>>, vector<16x64xbf16>
    %cst = arith.constant dense<0.000000e+00> : vector<2x64xf32>
    %8 = tpu.matmul %6, %7, %cst {dimension_numbers = #tpu.dot_dimension_numbers<[1], [0], [0], [1], [0, 0, 1, 1], [], []>} : vector<2x16xbf16>, vector<16x64xbf16>, vector<2x64xf32> -> vector<2x64xf32>
    %9 = arith.addf %4, %8 : vector<2x64xf32>
    %c0_7 = arith.constant 0 : index
    %c0_8 = arith.constant 0 : index
    %c0_9 = arith.constant 0 : index
    %10 = vector.load %arg2[%c0_7, %c0_8, %c0_9] : memref<1x2x64xf32, #tpu.memory_space<vmem>>, vector<1x2x64xf32>
    %11 = vector.shape_cast %10 : vector<1x2x64xf32> to vector<2x64xf32>
    %c0_10 = arith.constant 0 : index
    %c0_11 = arith.constant 0 : index
    %12 = vector.load %arg9[%c0_10, %c0_11] : memref<2x16xf32, #tpu.memory_space<vmem>>, vector<2x16xf32>
    %13 = arith.truncf %12 : vector<2x16xf32> to vector<2x16xbf16>
    %c0_12 = arith.constant 0 : index
    %c0_13 = arith.constant 0 : index
    %14 = vector.load %arg4[%c0_12, %c0_13] : memref<16x64xbf16, #tpu.memory_space<vmem>>, vector<16x64xbf16>
    %cst_14 = arith.constant dense<0.000000e+00> : vector<2x64xf32>
    %15 = tpu.matmul %13, %14, %cst_14 {dimension_numbers = #tpu.dot_dimension_numbers<[1], [0], [0], [1], [0, 0, 1, 1], [], []>} : vector<2x16xbf16>, vector<16x64xbf16>, vector<2x64xf32> -> vector<2x64xf32>
    %16 = arith.addf %11, %15 : vector<2x64xf32>
    %c0_15 = arith.constant 0 : index
    %c0_16 = arith.constant 0 : index
    %17 = vector.load %arg8[%c0_15, %c0_16] : memref<2x16xf32, #tpu.memory_space<vmem>>, vector<2x16xf32>
    %18 = vector.extract_strided_slice %9 {offsets = [0, 0], sizes = [2, 16], strides = [1, 1]} : vector<2x64xf32> to vector<2x16xf32>
    %19 = arith.negf %18 : vector<2x16xf32>
    %20 = math.exp %19 : vector<2x16xf32>
    %cst_17 = arith.constant 1.000000e+00 : f32
    %21 = vector.broadcast %cst_17 : f32 to vector<2x16xf32>
    %22 = arith.addf %21, %20 : vector<2x16xf32>
    %23 = arith.divf %21, %22 : vector<2x16xf32>
    %24 = vector.extract_strided_slice %9 {offsets = [0, 16], sizes = [2, 16], strides = [1, 1]} : vector<2x64xf32> to vector<2x16xf32>
    %25 = arith.negf %24 : vector<2x16xf32>
    %26 = math.exp %25 : vector<2x16xf32>
    %cst_18 = arith.constant 1.000000e+00 : f32
    %27 = vector.broadcast %cst_18 : f32 to vector<2x16xf32>
    %28 = arith.addf %27, %26 : vector<2x16xf32>
    %29 = arith.divf %27, %28 : vector<2x16xf32>
    %30 = vector.extract_strided_slice %9 {offsets = [0, 32], sizes = [2, 16], strides = [1, 1]} : vector<2x64xf32> to vector<2x16xf32>
    %31 = math.tanh %30 : vector<2x16xf32>
    %32 = vector.extract_strided_slice %9 {offsets = [0, 48], sizes = [2, 16], strides = [1, 1]} : vector<2x64xf32> to vector<2x16xf32>
    %33 = arith.negf %32 : vector<2x16xf32>
    %34 = math.exp %33 : vector<2x16xf32>
    %cst_19 = arith.constant 1.000000e+00 : f32
    %35 = vector.broadcast %cst_19 : f32 to vector<2x16xf32>
    %36 = arith.addf %35, %34 : vector<2x16xf32>
    %37 = arith.divf %35, %36 : vector<2x16xf32>
    %38 = arith.mulf %29, %17 : vector<2x16xf32>
    %39 = arith.mulf %23, %31 : vector<2x16xf32>
    %40 = arith.addf %38, %39 : vector<2x16xf32>
    %41 = math.tanh %40 : vector<2x16xf32>
    %42 = arith.mulf %37, %41 : vector<2x16xf32>
    %c0_20 = arith.constant 0 : index
    %c0_21 = arith.constant 0 : index
    %43 = vector.load %arg10[%c0_20, %c0_21] : memref<2x16xf32, #tpu.memory_space<vmem>>, vector<2x16xf32>
    %44 = vector.extract_strided_slice %16 {offsets = [0, 0], sizes = [2, 16], strides = [1, 1]} : vector<2x64xf32> to vector<2x16xf32>
    %45 = arith.negf %44 : vector<2x16xf32>
    %46 = math.exp %45 : vector<2x16xf32>
    %cst_22 = arith.constant 1.000000e+00 : f32
    %47 = vector.broadcast %cst_22 : f32 to vector<2x16xf32>
    %48 = arith.addf %47, %46 : vector<2x16xf32>
    %49 = arith.divf %47, %48 : vector<2x16xf32>
    %50 = vector.extract_strided_slice %16 {offsets = [0, 16], sizes = [2, 16], strides = [1, 1]} : vector<2x64xf32> to vector<2x16xf32>
    %51 = arith.negf %50 : vector<2x16xf32>
    %52 = math.exp %51 : vector<2x16xf32>
    %cst_23 = arith.constant 1.000000e+00 : f32
    %53 = vector.broadcast %cst_23 : f32 to vector<2x16xf32>
    %54 = arith.addf %53, %52 : vector<2x16xf32>
    %55 = arith.divf %53, %54 : vector<2x16xf32>
    %56 = vector.extract_strided_slice %16 {offsets = [0, 32], sizes = [2, 16], strides = [1, 1]} : vector<2x64xf32> to vector<2x16xf32>
    %57 = math.tanh %56 : vector<2x16xf32>
    %58 = vector.extract_strided_slice %16 {offsets = [0, 48], sizes = [2, 16], strides = [1, 1]} : vector<2x64xf32> to vector<2x16xf32>
    %59 = arith.negf %58 : vector<2x16xf32>
    %60 = math.exp %59 : vector<2x16xf32>
    %cst_24 = arith.constant 1.000000e+00 : f32
    %61 = vector.broadcast %cst_24 : f32 to vector<2x16xf32>
    %62 = arith.addf %61, %60 : vector<2x16xf32>
    %63 = arith.divf %61, %62 : vector<2x16xf32>
    %64 = arith.mulf %55, %43 : vector<2x16xf32>
    %65 = arith.mulf %49, %57 : vector<2x16xf32>
    %66 = arith.addf %64, %65 : vector<2x16xf32>
    %67 = math.tanh %66 : vector<2x16xf32>
    %68 = arith.mulf %63, %67 : vector<2x16xf32>
    %c0_25 = arith.constant 0 : index
    %c0_26 = arith.constant 0 : index
    %69 = vector.load %arg7[%c0_25, %c0_26] : memref<2x16xf32, #tpu.memory_space<vmem>>, vector<2x16xf32>
    tpu.vector_store %arg7[%c0_25, %c0_26], %42 {strides = array<i32>} : memref<2x16xf32, #tpu.memory_space<vmem>>, vector<2x16xf32>,
    %c0_27 = arith.constant 0 : index
    %c0_28 = arith.constant 0 : index
    %70 = vector.load %arg8[%c0_27, %c0_28] : memref<2x16xf32, #tpu.memory_space<vmem>>, vector<2x16xf32>
    tpu.vector_store %arg8[%c0_27, %c0_28], %40 {strides = array<i32>} : memref<2x16xf32, #tpu.memory_space<vmem>>, vector<2x16xf32>,
    %c0_29 = arith.constant 0 : index
    %c0_30 = arith.constant 0 : index
    %71 = vector.load %arg9[%c0_29, %c0_30] : memref<2x16xf32, #tpu.memory_space<vmem>>, vector<2x16xf32>
    tpu.vector_store %arg9[%c0_29, %c0_30], %68 {strides = array<i32>} : memref<2x16xf32, #tpu.memory_space<vmem>>, vector<2x16xf32>,
    %c0_31 = arith.constant 0 : index
    %c0_32 = arith.constant 0 : index
    %72 = vector.load %arg10[%c0_31, %c0_32] : memref<2x16xf32, #tpu.memory_space<vmem>>, vector<2x16xf32>
    tpu.vector_store %arg10[%c0_31, %c0_32], %66 {strides = array<i32>} : memref<2x16xf32, #tpu.memory_space<vmem>>, vector<2x16xf32>,
    %c0_33 = arith.constant 0 : index
    %c0_34 = arith.constant 0 : index
    %c0_35 = arith.constant 0 : index
    %73 = vector.load %arg5[%c0_33, %c0_34, %c0_35] : memref<1x2x16xf32, #tpu.memory_space<vmem>>, vector<1x2x16xf32>
    %74 = vector.shape_cast %73 : vector<1x2x16xf32> to vector<2x16xf32>
    %75 = vector.shape_cast %42 : vector<2x16xf32> to vector<1x2x16xf32>
    tpu.vector_store %arg5[%c0_33, %c0_34, %c0_35], %75 {strides = array<i32>} : memref<1x2x16xf32, #tpu.memory_space<vmem>>, vector<1x2x16xf32>,
    %c0_36 = arith.constant 0 : index
    %c0_37 = arith.constant 0 : index
    %c0_38 = arith.constant 0 : index
    %76 = vector.load %arg6[%c0_36, %c0_37, %c0_38] : memref<1x2x16xf32, #tpu.memory_space<vmem>>, vector<1x2x16xf32>
    %77 = vector.shape_cast %76 : vector<1x2x16xf32> to vector<2x16xf32>
    %78 = vector.shape_cast %68 : vector<2x16xf32> to vector<1x2x16xf32>
    tpu.vector_store %arg6[%c0_36, %c0_37, %c0_38], %78 {strides = array<i32>} : memref<1x2x16xf32, #tpu.memory_space<vmem>>, vector<1x2x16xf32>,
    return
  }
  func.func @transform_0(%arg0: i32) -> (i32, i32, i32) {
    %c0_i32 = arith.constant 0 : i32
    %c0_i32_0 = arith.constant 0 : i32
    %c0_i32_1 = arith.constant 0 : i32
    return %arg0, %c0_i32, %c0_i32_0 : i32, i32, i32
  }
  func.func @transform_1(%arg0: i32) -> (i32, i32, i32) {
    %c15_i32 = arith.constant 15 : i32
    %0 = arith.subi %c15_i32, %arg0 : i32
    %c0_i32 = arith.constant 0 : i32
    %c0_i32_0 = arith.constant 0 : i32
    %c0_i32_1 = arith.constant 0 : i32
    return %0, %c0_i32, %c0_i32_0 : i32, i32, i32
  }
  func.func @transform_2(%arg0: i32) -> (i32, i32) {
    %c0_i32 = arith.constant 0 : i32
    %c0_i32_0 = arith.constant 0 : i32
    %c0_i32_1 = arith.constant 0 : i32
    return %c0_i32, %c0_i32_0 : i32, i32
  }
  func.func @transform_3(%arg0: i32) -> (i32, i32) {
    %c0_i32 = arith.constant 0 : i32
    %c0_i32_0 = arith.constant 0 : i32
    %c0_i32_1 = arith.constant 0 : i32
    return %c0_i32, %c0_i32_0 : i32, i32
  }
  func.func @transform_4(%arg0: i32) -> (i32, i32, i32) {
    %c0_i32 = arith.constant 0 : i32
    %c0_i32_0 = arith.constant 0 : i32
    %c0_i32_1 = arith.constant 0 : i32
    return %arg0, %c0_i32, %c0_i32_0 : i32, i32, i32
  }
  func.func @transform_5(%arg0: i32) -> (i32, i32, i32) {
    %c15_i32 = arith.constant 15 : i32
    %0 = arith.subi %c15_i32, %arg0 : i32
    %c0_i32 = arith.constant 0 : i32
    %c0_i32_0 = arith.constant 0 : i32
    %c0_i32_1 = arith.constant 0 : i32
    return %0, %c0_i32, %c0_i32_0 : i32, i32, i32
  }
}

module attributes {stable_mosaic.version = 11 : i64} {
  func.func @_ff_post_kernel(%arg0: i32, %arg1: memref<8x32xf32, #tpu.memory_space<vmem>>, %arg2: memref<8x16xf32, #tpu.memory_space<vmem>>, %arg3: memref<8x16xf32, #tpu.memory_space<vmem>>, %arg4: memref<8x128xf32, #tpu.memory_space<vmem>>, %arg5: memref<32x32xbf16, #tpu.memory_space<vmem>>, %arg6: memref<16x32xbf16, #tpu.memory_space<vmem>>, %arg7: memref<16x32xbf16, #tpu.memory_space<vmem>>, %arg8: memref<1x32xf32, #tpu.memory_space<vmem>>, %arg9: memref<32x128xbf16, #tpu.memory_space<vmem>>, %arg10: memref<1x128xf32, #tpu.memory_space<vmem>>, %arg11: memref<32x16xbf16, #tpu.memory_space<vmem>>, %arg12: memref<16x16xbf16, #tpu.memory_space<vmem>>, %arg13: memref<16x16xbf16, #tpu.memory_space<vmem>>, %arg14: memref<1x16xf32, #tpu.memory_space<vmem>>, %arg15: memref<1x16xf32, #tpu.memory_space<vmem>>, %arg16: memref<1x1xf32, #tpu.memory_space<vmem>>, %arg17: memref<8x128xf32, #tpu.memory_space<vmem>>, %arg18: memref<8x1xf32, #tpu.memory_space<vmem>>) attributes {dimension_semantics = [#tpu.dimension_semantics<parallel>], iteration_bounds = array<i64: 4>, scalar_prefetch = 0 : i64, scratch_operands = 0 : i64, tpu.core_type = #tpu.core_type<tc>, window_params = [{transform_indices = @transform_0, window_bounds = array<i64: 8, 32>}, {transform_indices = @transform_1, window_bounds = array<i64: 8, 16>}, {transform_indices = @transform_2, window_bounds = array<i64: 8, 16>}, {transform_indices = @transform_3, window_bounds = array<i64: 8, 128>}, {pipeline_mode = #tpu.pipeline_mode<synchronous>, transform_indices = @transform_4, window_bounds = array<i64: 32, 32>}, {pipeline_mode = #tpu.pipeline_mode<synchronous>, transform_indices = @transform_5, window_bounds = array<i64: 16, 32>}, {pipeline_mode = #tpu.pipeline_mode<synchronous>, transform_indices = @transform_6, window_bounds = array<i64: 16, 32>}, {pipeline_mode = #tpu.pipeline_mode<synchronous>, transform_indices = @transform_7, window_bounds = array<i64: 1, 32>}, {pipeline_mode = #tpu.pipeline_mode<synchronous>, transform_indices = @transform_8, window_bounds = array<i64: 32, 128>}, {pipeline_mode = #tpu.pipeline_mode<synchronous>, transform_indices = @transform_9, window_bounds = array<i64: 1, 128>}, {pipeline_mode = #tpu.pipeline_mode<synchronous>, transform_indices = @transform_10, window_bounds = array<i64: 32, 16>}, {pipeline_mode = #tpu.pipeline_mode<synchronous>, transform_indices = @transform_11, window_bounds = array<i64: 16, 16>}, {pipeline_mode = #tpu.pipeline_mode<synchronous>, transform_indices = @transform_12, window_bounds = array<i64: 16, 16>}, {pipeline_mode = #tpu.pipeline_mode<synchronous>, transform_indices = @transform_13, window_bounds = array<i64: 1, 16>}, {pipeline_mode = #tpu.pipeline_mode<synchronous>, transform_indices = @transform_14, window_bounds = array<i64: 1, 16>}, {pipeline_mode = #tpu.pipeline_mode<synchronous>, transform_indices = @transform_15, window_bounds = array<i64: 1, 1>}, {transform_indices = @transform_16, window_bounds = array<i64: 8, 128>}, {transform_indices = @transform_17, window_bounds = array<i64: 8, 1>}]} {
    %c0 = arith.constant 0 : index
    %c0_0 = arith.constant 0 : index
    %0 = vector.load %arg1[%c0, %c0_0] : memref<8x32xf32, #tpu.memory_space<vmem>>, vector<8x32xf32>
    %1 = arith.truncf %0 : vector<8x32xf32> to vector<8x32xbf16>
    %c0_1 = arith.constant 0 : index
    %c0_2 = arith.constant 0 : index
    %2 = vector.load %arg2[%c0_1, %c0_2] : memref<8x16xf32, #tpu.memory_space<vmem>>, vector<8x16xf32>
    %3 = arith.truncf %2 : vector<8x16xf32> to vector<8x16xbf16>
    %c0_3 = arith.constant 0 : index
    %c0_4 = arith.constant 0 : index
    %4 = vector.load %arg3[%c0_3, %c0_4] : memref<8x16xf32, #tpu.memory_space<vmem>>, vector<8x16xf32>
    %5 = arith.truncf %4 : vector<8x16xf32> to vector<8x16xbf16>
    %c0_5 = arith.constant 0 : index
    %c0_6 = arith.constant 0 : index
    %6 = vector.load %arg5[%c0_5, %c0_6] : memref<32x32xbf16, #tpu.memory_space<vmem>>, vector<32x32xbf16>
    %cst = arith.constant dense<0.000000e+00> : vector<8x32xf32>
    %7 = tpu.matmul %1, %6, %cst {dimension_numbers = #tpu.dot_dimension_numbers<[1], [0], [0], [1], [0, 0, 1, 1], [], []>} : vector<8x32xbf16>, vector<32x32xbf16>, vector<8x32xf32> -> vector<8x32xf32>
    %c0_7 = arith.constant 0 : index
    %c0_8 = arith.constant 0 : index
    %8 = vector.load %arg6[%c0_7, %c0_8] : memref<16x32xbf16, #tpu.memory_space<vmem>>, vector<16x32xbf16>
    %cst_9 = arith.constant dense<0.000000e+00> : vector<8x32xf32>
    %9 = tpu.matmul %3, %8, %cst_9 {dimension_numbers = #tpu.dot_dimension_numbers<[1], [0], [0], [1], [0, 0, 1, 1], [], []>} : vector<8x16xbf16>, vector<16x32xbf16>, vector<8x32xf32> -> vector<8x32xf32>
    %10 = arith.addf %7, %9 : vector<8x32xf32>
    %c0_10 = arith.constant 0 : index
    %c0_11 = arith.constant 0 : index
    %11 = vector.load %arg7[%c0_10, %c0_11] : memref<16x32xbf16, #tpu.memory_space<vmem>>, vector<16x32xbf16>
    %cst_12 = arith.constant dense<0.000000e+00> : vector<8x32xf32>
    %12 = tpu.matmul %5, %11, %cst_12 {dimension_numbers = #tpu.dot_dimension_numbers<[1], [0], [0], [1], [0, 0, 1, 1], [], []>} : vector<8x16xbf16>, vector<16x32xbf16>, vector<8x32xf32> -> vector<8x32xf32>
    %13 = arith.addf %10, %12 : vector<8x32xf32>
    %c0_13 = arith.constant 0 : index
    %c0_14 = arith.constant 0 : index
    %14 = vector.load %arg8[%c0_13, %c0_14] : memref<1x32xf32, #tpu.memory_space<vmem>>, vector<1x32xf32>
    %15 = vector.broadcast %14 : vector<1x32xf32> to vector<8x32xf32>
    %16 = arith.addf %13, %15 : vector<8x32xf32>
    %cst_15 = arith.constant 0.000000e+00 : f32
    %17 = vector.broadcast %cst_15 : f32 to vector<8x32xf32>
    %18 = arith.maximumf %16, %17 : vector<8x32xf32>
    %19 = arith.truncf %18 : vector<8x32xf32> to vector<8x32xbf16>
    %c0_16 = arith.constant 0 : index
    %c0_17 = arith.constant 0 : index
    %20 = vector.load %arg9[%c0_16, %c0_17] : memref<32x128xbf16, #tpu.memory_space<vmem>>, vector<32x128xbf16>
    %cst_18 = arith.constant dense<0.000000e+00> : vector<8x128xf32>
    %21 = tpu.matmul %19, %20, %cst_18 {dimension_numbers = #tpu.dot_dimension_numbers<[1], [0], [0], [1], [0, 0, 1, 1], [], []>} : vector<8x32xbf16>, vector<32x128xbf16>, vector<8x128xf32> -> vector<8x128xf32>
    %c0_19 = arith.constant 0 : index
    %c0_20 = arith.constant 0 : index
    %22 = vector.load %arg10[%c0_19, %c0_20] : memref<1x128xf32, #tpu.memory_space<vmem>>, vector<1x128xf32>
    %23 = vector.broadcast %22 : vector<1x128xf32> to vector<8x128xf32>
    %24 = arith.addf %21, %23 : vector<8x128xf32>
    %cst_21 = arith.constant 0.000000e+00 : f32
    %25 = vector.broadcast %cst_21 : f32 to vector<8x128xf32>
    %26 = arith.maximumf %24, %25 : vector<8x128xf32>
    %c0_22 = arith.constant 0 : index
    %c0_23 = arith.constant 0 : index
    %27 = vector.load %arg4[%c0_22, %c0_23] : memref<8x128xf32, #tpu.memory_space<vmem>>, vector<8x128xf32>
    %28 = arith.mulf %26, %27 : vector<8x128xf32>
    %c0_24 = arith.constant 0 : index
    %c0_25 = arith.constant 0 : index
    %29 = vector.load %arg17[%c0_24, %c0_25] : memref<8x128xf32, #tpu.memory_space<vmem>>, vector<8x128xf32>
    tpu.vector_store %arg17[%c0_24, %c0_25], %28 {strides = array<i32>} : memref<8x128xf32, #tpu.memory_space<vmem>>, vector<8x128xf32>,
    %c0_26 = arith.constant 0 : index
    %c0_27 = arith.constant 0 : index
    %30 = vector.load %arg11[%c0_26, %c0_27] : memref<32x16xbf16, #tpu.memory_space<vmem>>, vector<32x16xbf16>
    %cst_28 = arith.constant dense<0.000000e+00> : vector<8x16xf32>
    %31 = tpu.matmul %1, %30, %cst_28 {dimension_numbers = #tpu.dot_dimension_numbers<[1], [0], [0], [1], [0, 0, 1, 1], [], []>} : vector<8x32xbf16>, vector<32x16xbf16>, vector<8x16xf32> -> vector<8x16xf32>
    %c0_29 = arith.constant 0 : index
    %c0_30 = arith.constant 0 : index
    %32 = vector.load %arg12[%c0_29, %c0_30] : memref<16x16xbf16, #tpu.memory_space<vmem>>, vector<16x16xbf16>
    %cst_31 = arith.constant dense<0.000000e+00> : vector<8x16xf32>
    %33 = tpu.matmul %3, %32, %cst_31 {dimension_numbers = #tpu.dot_dimension_numbers<[1], [0], [0], [1], [0, 0, 1, 1], [], []>} : vector<8x16xbf16>, vector<16x16xbf16>, vector<8x16xf32> -> vector<8x16xf32>
    %34 = arith.addf %31, %33 : vector<8x16xf32>
    %c0_32 = arith.constant 0 : index
    %c0_33 = arith.constant 0 : index
    %35 = vector.load %arg13[%c0_32, %c0_33] : memref<16x16xbf16, #tpu.memory_space<vmem>>, vector<16x16xbf16>
    %cst_34 = arith.constant dense<0.000000e+00> : vector<8x16xf32>
    %36 = tpu.matmul %5, %35, %cst_34 {dimension_numbers = #tpu.dot_dimension_numbers<[1], [0], [0], [1], [0, 0, 1, 1], [], []>} : vector<8x16xbf16>, vector<16x16xbf16>, vector<8x16xf32> -> vector<8x16xf32>
    %37 = arith.addf %34, %36 : vector<8x16xf32>
    %c0_35 = arith.constant 0 : index
    %c0_36 = arith.constant 0 : index
    %38 = vector.load %arg14[%c0_35, %c0_36] : memref<1x16xf32, #tpu.memory_space<vmem>>, vector<1x16xf32>
    %39 = vector.broadcast %38 : vector<1x16xf32> to vector<8x16xf32>
    %40 = arith.addf %37, %39 : vector<8x16xf32>
    %cst_37 = arith.constant 0.000000e+00 : f32
    %41 = vector.broadcast %cst_37 : f32 to vector<8x16xf32>
    %42 = arith.maximumf %40, %41 : vector<8x16xf32>
    %c0_38 = arith.constant 0 : index
    %c0_39 = arith.constant 0 : index
    %43 = vector.load %arg15[%c0_38, %c0_39] : memref<1x16xf32, #tpu.memory_space<vmem>>, vector<1x16xf32>
    %44 = vector.broadcast %43 : vector<1x16xf32> to vector<8x16xf32>
    %45 = arith.mulf %42, %44 : vector<8x16xf32>
    %cst_40 = arith.constant dense<0.000000e+00> : vector<8xf32>
    %46 = vector.multi_reduction <add>, %45, %cst_40 [1] : vector<8x16xf32> to vector<8xf32>
    %47 = vector.shape_cast %46 : vector<8xf32> to vector<8x1xf32>
    %c0_41 = arith.constant 0 : index
    %c0_42 = arith.constant 0 : index
    %48 = vector.load %arg16[%c0_41, %c0_42] : memref<1x1xf32, #tpu.memory_space<vmem>>, vector<1x1xf32>
    %49 = vector.broadcast %48 : vector<1x1xf32> to vector<8x1xf32>
    %50 = arith.addf %47, %49 : vector<8x1xf32>
    %51 = arith.negf %50 : vector<8x1xf32>
    %52 = math.exp %51 : vector<8x1xf32>
    %cst_43 = arith.constant 1.000000e+00 : f32
    %53 = vector.broadcast %cst_43 : f32 to vector<8x1xf32>
    %54 = arith.addf %53, %52 : vector<8x1xf32>
    %55 = arith.divf %53, %54 : vector<8x1xf32>
    %c0_44 = arith.constant 0 : index
    %c0_45 = arith.constant 0 : index
    %56 = vector.load %arg18[%c0_44, %c0_45] : memref<8x1xf32, #tpu.memory_space<vmem>>, vector<8x1xf32>
    tpu.vector_store %arg18[%c0_44, %c0_45], %55 {strides = array<i32>} : memref<8x1xf32, #tpu.memory_space<vmem>>, vector<8x1xf32>,
    return
  }
  func.func @transform_0(%arg0: i32) -> (i32, i32) {
    %c0_i32 = arith.constant 0 : i32
    %c0_i32_0 = arith.constant 0 : i32
    return %arg0, %c0_i32 : i32, i32
  }
  func.func @transform_1(%arg0: i32) -> (i32, i32) {
    %c0_i32 = arith.constant 0 : i32
    %c0_i32_0 = arith.constant 0 : i32
    return %arg0, %c0_i32 : i32, i32
  }
  func.func @transform_2(%arg0: i32) -> (i32, i32) {
    %c0_i32 = arith.constant 0 : i32
    %c0_i32_0 = arith.constant 0 : i32
    return %arg0, %c0_i32 : i32, i32
  }
  func.func @transform_3(%arg0: i32) -> (i32, i32) {
    %c0_i32 = arith.constant 0 : i32
    %c0_i32_0 = arith.constant 0 : i32
    return %arg0, %c0_i32 : i32, i32
  }
  func.func @transform_4(%arg0: i32) -> (i32, i32) {
    %c0_i32 = arith.constant 0 : i32
    %c0_i32_0 = arith.constant 0 : i32
    %c0_i32_1 = arith.constant 0 : i32
    return %c0_i32, %c0_i32_0 : i32, i32
  }
  func.func @transform_5(%arg0: i32) -> (i32, i32) {
    %c0_i32 = arith.constant 0 : i32
    %c0_i32_0 = arith.constant 0 : i32
    %c0_i32_1 = arith.constant 0 : i32
    return %c0_i32, %c0_i32_0 : i32, i32
  }
  func.func @transform_6(%arg0: i32) -> (i32, i32) {
    %c0_i32 = arith.constant 0 : i32
    %c0_i32_0 = arith.constant 0 : i32
    %c0_i32_1 = arith.constant 0 : i32
    return %c0_i32, %c0_i32_0 : i32, i32
  }
  func.func @transform_7(%arg0: i32) -> (i32, i32) {
    %c0_i32 = arith.constant 0 : i32
    %c0_i32_0 = arith.constant 0 : i32
    %c0_i32_1 = arith.constant 0 : i32
    return %c0_i32, %c0_i32_0 : i32, i32
  }
  func.func @transform_8(%arg0: i32) -> (i32, i32) {
    %c0_i32 = arith.constant 0 : i32
    %c0_i32_0 = arith.constant 0 : i32
    %c0_i32_1 = arith.constant 0 : i32
    return %c0_i32, %c0_i32_0 : i32, i32
  }
  func.func @transform_9(%arg0: i32) -> (i32, i32) {
    %c0_i32 = arith.constant 0 : i32
    %c0_i32_0 = arith.constant 0 : i32
    %c0_i32_1 = arith.constant 0 : i32
    return %c0_i32, %c0_i32_0 : i32, i32
  }
  func.func @transform_10(%arg0: i32) -> (i32, i32) {
    %c0_i32 = arith.constant 0 : i32
    %c0_i32_0 = arith.constant 0 : i32
    %c0_i32_1 = arith.constant 0 : i32
    return %c0_i32, %c0_i32_0 : i32, i32
  }
  func.func @transform_11(%arg0: i32) -> (i32, i32) {
    %c0_i32 = arith.constant 0 : i32
    %c0_i32_0 = arith.constant 0 : i32
    %c0_i32_1 = arith.constant 0 : i32
    return %c0_i32, %c0_i32_0 : i32, i32
  }
  func.func @transform_12(%arg0: i32) -> (i32, i32) {
    %c0_i32 = arith.constant 0 : i32
    %c0_i32_0 = arith.constant 0 : i32
    %c0_i32_1 = arith.constant 0 : i32
    return %c0_i32, %c0_i32_0 : i32, i32
  }
  func.func @transform_13(%arg0: i32) -> (i32, i32) {
    %c0_i32 = arith.constant 0 : i32
    %c0_i32_0 = arith.constant 0 : i32
    %c0_i32_1 = arith.constant 0 : i32
    return %c0_i32, %c0_i32_0 : i32, i32
  }
  func.func @transform_14(%arg0: i32) -> (i32, i32) {
    %c0_i32 = arith.constant 0 : i32
    %c0_i32_0 = arith.constant 0 : i32
    %c0_i32_1 = arith.constant 0 : i32
    return %c0_i32, %c0_i32_0 : i32, i32
  }
  func.func @transform_15(%arg0: i32) -> (i32, i32) {
    %c0_i32 = arith.constant 0 : i32
    %c0_i32_0 = arith.constant 0 : i32
    %c0_i32_1 = arith.constant 0 : i32
    return %c0_i32, %c0_i32_0 : i32, i32
  }
  func.func @transform_16(%arg0: i32) -> (i32, i32) {
    %c0_i32 = arith.constant 0 : i32
    %c0_i32_0 = arith.constant 0 : i32
    return %arg0, %c0_i32 : i32, i32
  }
  func.func @transform_17(%arg0: i32) -> (i32, i32) {
    %c0_i32 = arith.constant 0 : i32
    %c0_i32_0 = arith.constant 0 : i32
    return %arg0, %c0_i32 : i32, i32
  }
}

</mosaic_0001>

<bundles_post_ra>
// kernel: tile.23
= control target key start
LH: loop header
LB: loop body
LE: loop exit
PB: predicated region body
PF: predicated region fallthrough
CT: control target
= control target key end

     0   :  { %s22_s0 = inlined_call_operand.vmem [shape: f32[16], index: 0, kind: input, shape index: {}]   ;;  %s23_s1 = inlined_call_operand.vmem [shape: f32[2,16], index: 1, kind: output, shape index: {}]  }
   0x1   :  { %v4_v0 = vld [vmem:[%s22_s0] ss:$0 sm:$0xff] }
   0x2   :  { %5 = vst [vmem:[%s23_s1] sm:$0x3] %v4_v0 }

// kernel: tile.24
= control target key start
LH: loop header
LB: loop body
LE: loop exit
PB: predicated region body
PF: predicated region fallthrough
CT: control target
= control target key end

     0   :  { %vm8_vm0 = vcmask 130048   ;;  %vm14_vm1 = vcmask 261248   ;;  %s42_s0 = inlined_call_operand.vmem [shape: f32[2,16], index: 0, kind: input, shape index: {}]   ;;  %s43_s1 = inlined_call_operand.vmem [shape: f32[32], index: 1, kind: output, shape index: {}]  }
   0x1   :  { %v5_v0 = vld [vmem:[%s42_s0] sm:$0x3]  ;;  %s25_s0 = smov 16  }
   0x2   :  { %6 = vst [vmem:[#allocation1] sm:$0x3] %v5_v0 }
   0x9   :  { %v11_v1 = vld [vmem:[#allocation1 + $0x1] sm:$0x1]   ;;  %v7_v2 = vld [vmem:[#allocation1] sm:$0x1]  }
   0xa   :  { %12 = vrot.lane.b32.xlu0 %v11_v1, %s25_s0  ;;  %9 = vst.msk [vmem:[#allocation0] sm:$0x1] %vm8_vm0, %v7_v2  }
  0x7c   :  { %v13_v3 = vpop.permute.xlu0 %12  }
  0x7d   :  { %15 = vst.msk [vmem:[#allocation0] sm:$0x1] %vm14_vm1, %v13_v3  }
  0x84   :  { %v20_v4 = vld [vmem:[#allocation0] sm:$0x1] }
  0x85   :  { %23 = vst [vmem:[%s43_s1] sm:$0x1] %v20_v4 }

// kernel: openunmix_mtl_forward.10
= control target key start
LH: loop header
LB: loop body
LE: loop exit
PB: predicated region body
PF: predicated region fallthrough
CT: control target
= control target key end

     0   :  { %s675_s18 = smov 0   ;;  %s720_s0 = inlined_call_operand.vmem [shape: f32[16,2,64], index: 0, kind: input, shape index: {}]   ;;  %s721_s1 = inlined_call_operand.vmem [shape: f32[16,2,64], index: 1, kind: input, shape index: {}]   ;;  %s722_s2 = inlined_call_operand.vmem [shape: bf16[16,64], index: 2, kind: input, shape index: {}]   ;;  %s723_s3 = inlined_call_operand.vmem [shape: bf16[16,64], index: 3, kind: input, shape index: {}]   ;;  %s724_s4 = inlined_call_operand.vmem [shape: f32[16,2,16], index: 4, kind: output, shape index: {0}]   ;;  %s725_s5 = inlined_call_operand.vmem [shape: f32[16,2,16], index: 5, kind: output, shape index: {1}]  }
   0x1 LB: > { %s561_s19 = sadd.s32 4294967295, %s635_s18   ;;  %p565_p0 = scmp.ge.s32.totalorder %s635_s18, 1  ;;  %s635_s18 = sphi %s675_s18, %s16_s18  }
   0x2   : > { %p204_p1 = scmp.lt.s32.totalorder %s635_s18, 17 }
   0x4   : > { %p205_p2 = pnand %p565_p0, %p204_p1 }
   0x5   : > { %p240_p3 = scmp.lt.s32.totalorder (!%p205_p2), %s561_s19, 15  ;;  %s244_s20 = ssub.s32 (!%p205_p2), 15, %s561_s19 }
   0x6   : > { %208 = sbr.rel (%p205_p2) target bundleno = 722 (0x2d2), region = 36  ;;  %p245_p4 = scmp.lt.s32.totalorder (!%p205_p2), %s244_s20, 15 }
   0x7   : > { %p570_p5 = scmp.ne.s32.totalorder (!%p205_p2), %s561_s19, 0 }
   0xb   : > { %s241_s21 = scalar_select %p240_p3, %s561_s19, 15 }
   0xc   : > { %s727_s20 = smov (!%p245_p4, %s244_s20), 15  ;;  %264 = sbr.rel (%p570_p5) target bundleno = 20 (0x14), region = 40 }
   0xd   : > { %s566_s22 = sshll.u32 %s241_s21, 1  ;;  %s567_s26 = sshll.u32 %s727_s20, 1 }
   0xe   : > { %s686_s25 = scalar_lea.vmem %s720_s0, %s566_s22  ;;  %s691_s29 = scalar_lea.vmem %s721_s1, %s567_s26 }
   0xf   : > { %s696_s7 = scalar_lea.vmem %s724_s4, %s566_s22  ;;  %s701_s10 = scalar_lea.vmem %s725_s5, %s567_s26 }
  0x11   : > { %vm265_vm0 = vcmask 123904   ;;  %v637_v0 = vmov 0.0  }
  0x12   : > { %266 = vst.msk [vmem:[#allocation2] sm:$0x3] %vm265_vm0, %v637_v0  ;;  %267 = vst.msk [vmem:[#allocation3] sm:$0x3] %vm265_vm0, %v637_v0 }
  0x13   : > { %268 = vst.msk [vmem:[#allocation4] sm:$0x3] %vm265_vm0, %v637_v0  ;;  %269 = vst.msk [vmem:[#allocation5] sm:$0x3] %vm265_vm0, %v637_v0 }
  0x14 PF: > { %v611_v1 = vld [vmem:[%s722_s2] sm:$0xff]   ;;  %v638_v2 = vmov 0.0   ;;  %vm639_vm1 = vmmov 0   ;;  %vm281_vm2 = vcmask 130048   ;;  %s640_s15 = smov 16   ;;  %s641_s16 = smov 96  }
  0x15   : > { %583 = vmatprep.subr.bf16.mxu0 %v638_v2  ;;  %589 = vmatprep.subr.bf16.mxu1 %v638_v2  ;;  %v612_v3 = vld [vmem:[%s723_s3] sm:$0xff]   ;;  %s642_s17 = smov 32   ;;  %s643_s19 = smov 112   ;;  %vm443_vm3 = vcmask 123904  }
  0x16   : > { %584 = vmatpush3.bf16.msra.mxu0 %v611_v1  ;;  %585 = vmatprep.mubr.msk.bf16.mxu0 %vm639_vm1, %v638_v2  ;;  %v270_v10 = vld [vmem:[%s686_s25] sm:$0x3]  ;;  %s644_s20 = smov 80  }
  0x17   : > { %590 = vmatpush3.bf16.msra.mxu1 %v612_v3  ;;  %591 = vmatprep.mubr.msk.bf16.mxu1 %vm639_vm1, %v638_v2  ;;  %v326_v11 = vld [vmem:[%s691_s29] sm:$0x3] }
  0x19   : > { %v271_v4 = vld [vmem:[#allocation2] sm:$0x3]  ;;  %v381_v8 = vld [vmem:[#allocation3] sm:$0x3] }
  0x1a   : > { %v327_v5 = vld [vmem:[#allocation4] sm:$0x3]  ;;  %v272_v6 = vpack.c.bf16 %v271_v4, %v271_v4  ;;  %390 = vrot.lane.b32.xlu1 %v381_v8, %s640_s15  ;;  %v410_v9 = vld [vmem:[#allocation5] sm:$0x3] }
  0x1b   : > { %v328_v7 = vpack.c.bf16 %v327_v5, %v327_v5 }
  0x1c   : > { %586 = vmatmul.mubr.msk.bf16.vlgmr.msra.gmra.mxu0 %vm281_vm2, %v272_v6 }
  0x1d   : > { %592 = vmatmul.mubr.msk.bf16.vlgmr.msra.gmra.mxu1 %vm281_vm2, %v328_v7 }
  0x1e   : > { %419 = vrot.lane.b32.xlu1 %v410_v9, %s640_s15 }
  0x8c   : > { %v391_v36 = vpop.permute.xlu1 %390 }
  0x90   : > { %v420_v38 = vpop.permute.xlu1 %419 }
  0xdc   : > { %v319_v12 = vpop.f32.mrf.mxu0 }
  0xdd   : > { %v325_v13 = vadd.f32 %v319_v12, %v270_v10  ;;  %v374_v14 = vpop.f32.mrf.mxu1 }
  0xde   : > { %v380_v15 = vadd.f32 %v374_v14, %v326_v11  ;;  %v587_v16 = vpop.f32.mrf.mxu0 }
  0xdf   : > { %613 = vtanh.f32 %v325_v13  ;;  %v593_v17 = vpop.f32.mrf.mxu1  ;;  %v575_v24 = vmul.f32 -1.442695, %v325_v13 }
  0xe0   : > { %v322_v18 = vpop.f32.mrf.mxu0  ;;  %615 = vtanh.f32 %v380_v15  ;;  %v576_v25 = vmul.f32 -1.442695, %v380_v15 }
  0xe1   : > { %v377_v19 = vpop.f32.mrf.mxu1  ;;  %617 = vpow2.f32 %v575_v24 }
  0xe2   : > { %v588_v20 = vpop.f32.mrf.mxu0  ;;  %619 = vpow2.f32 %v576_v25 }
  0xe3   : > { %v594_v21 = vpop.f32.mrf.mxu1 }
  0xec   : > { %v614_v22 = vpop.eup %613 }
  0xed   : > { %395 = vrot.lane.b32.xlu0 %v614_v22, %s641_s16  ;;  %v616_v23 = vpop.eup %615 }
  0xee   : > { %v618_v26 = vpop.eup %617 }
  0xef   : > { %v385_v27 = vadd.f32 1.0, %v618_v26  ;;  %v620_v28 = vpop.eup %619 }
  0xf0   : > { %v414_v29 = vadd.f32 1.0, %v620_v28 }
  0xf1   : > { %424 = vrot.lane.b32.xlu0 %v616_v23, %s641_s16  ;;  %621 = vrcp.f32 %v385_v27 }
  0xf2   : > { %623 = vrcp.f32 %v414_v29 }
  0xfe   : > { %v622_v30 = vpop.eup %621 }
  0xff   : > { %v624_v33 = vpop.eup %623  ;;  %v393_v37 = vmul.f32 %v622_v30, %v391_v36 }
 0x100   : > { %v422_v41 = vmul.f32 %v624_v33, %v420_v38 }
 0x15f   : > { %v396_v31 = vpop.permute.xlu0 %395 }
 0x160   : > { %v398_v32 = vmul.f32 %v622_v30, %v396_v31 }
 0x162   : > { %400 = vrot.lane.b32.xlu0 %v398_v32, %s640_s15 }
 0x163   : > { %v425_v34 = vpop.permute.xlu0 %424 }
 0x164   : > { %v427_v35 = vmul.f32 %v624_v33, %v425_v34 }
 0x166   : > { %429 = vrot.lane.b32.xlu1 %v427_v35, %s640_s15 }
 0x1d4   : > { %v401_v39 = vpop.permute.xlu0 %400 }
 0x1d5   : > { %v403_v40 = vadd.f32 %v401_v39, %v393_v37 }
 0x1d7   : > { %625 = vtanh.f32 %v403_v40 }
 0x1d8   : > { %v430_v42 = vpop.permute.xlu1 %429 }
 0x1d9   : > { %v432_v43 = vadd.f32 %v430_v42, %v422_v41 }
 0x1db   : > { %627 = vtanh.f32 %v432_v43 }
 0x1e4   : > { %v626_v44 = vpop.eup %625 }
 0x1e5   : > { %406 = vrot.lane.b32.xlu0 %v626_v44, %s642_s17 }
 0x1e8   : > { %v628_v45 = vpop.eup %627 }
 0x1e9   : > { %435 = vrot.lane.b32.xlu1 %v628_v45, %s642_s17 }
 0x1ed   : > { %446 = vrot.lane.b32.xlu1 %v403_v40, %s643_s19 }
 0x1f1   : > { %456 = vrot.lane.b32.xlu1 %v432_v43, %s643_s19 }
 0x257   : > { %v407_v46 = vpop.permute.xlu0 %406 }
 0x258   : > { %v409_v47 = vmul.f32 %v622_v30, %v407_v46 }
 0x25a   : > { %440 = vrot.lane.b32.xlu0 %v409_v47, %s644_s20 }
 0x25b   : > { %v436_v48 = vpop.permute.xlu1 %435 }
 0x25c   : > { %v438_v49 = vmul.f32 %v624_v33, %v436_v48 }
 0x25e   : > { %451 = vrot.lane.b32.xlu0 %v438_v49, %s644_s20 }
 0x25f   : > { %v447_v50 = vpop.permute.xlu1 %446 }
 0x260   : > { %449 = vst.msk [vmem:[#allocation3] sm:$0x3] %vm443_vm3, %v447_v50 }
 0x263   : > { %v457_v51 = vpop.permute.xlu1 %456 }
 0x264   : > { %459 = vst.msk [vmem:[#allocation5] sm:$0x3] %vm443_vm3, %v457_v51 }
 0x2cc   : > { %v441_v52 = vpop.permute.xlu0 %440 }
 0x2cd   : > { %444 = vst.msk [vmem:[#allocation2] sm:$0x3] %vm443_vm3, %v441_v52  ;;  %460 = vst.msk [vmem:[%s696_s7] sm:$0x3] %vm443_vm3, %v441_v52 }
 0x2d0   : > { %v452_v53 = vpop.permute.xlu0 %451 }
 0x2d1   : > { %454 = vst.msk [vmem:[#allocation4] sm:$0x3] %vm443_vm3, %v452_v53  ;;  %461 = vst.msk [vmem:[%s701_s10] sm:$0x3] %vm443_vm3, %v452_v53 }
 0x2d2 PF: > { %s16_s18 = sadd.s32 1, %s635_s18  }
 0x2d3   : > { %p13_p6 = scmp.ge.s32.totalorder %s16_s18, 18  }
 0x2d5   :  { %15 = sbr.rel (!%p13_p6) target bundleno = 1 (0x1), region = 85 }

// kernel: openunmix_mtl_forward.8
= control target key start
LH: loop header
LB: loop body
LE: loop exit
PB: predicated region body
PF: predicated region fallthrough
CT: control target
= control target key end

     0   :  { %s515_s18 = smov 0   ;;  %s572_s0 = inlined_call_operand.vmem [shape: f32[32,128], index: 0, kind: input, shape index: {}]   ;;  %s573_s1 = inlined_call_operand.vmem [shape: f32[1,128], index: 1, kind: input, shape index: {}]   ;;  %s574_s2 = inlined_call_operand.vmem [shape: f32[1,128], index: 2, kind: input, shape index: {}]   ;;  %s575_s3 = inlined_call_operand.vmem [shape: bf16[128,32], index: 3, kind: input, shape index: {}]   ;;  %s576_s4 = inlined_call_operand.vmem [shape: f32[1,32], index: 4, kind: input, shape index: {}]   ;;  %s577_s5 = inlined_call_operand.vmem [shape: f32[32,32], index: 5, kind: output, shape index: {}]  }
   0x1 LB: > { %s406_s19 = sadd.s32 4294967295, %s481_s18   ;;  %p410_p0 = scmp.ge.s32.totalorder %s481_s18, 1  ;;  %s481_s18 = sphi %s515_s18, %s15_s18  }
   0x2   : > { %p186_p1 = scmp.lt.s32.totalorder %s481_s18, 5 }
   0x4   : > { %p187_p2 = pnand %p410_p0, %p186_p1 }
   0x5   : > { %p212_p3 = scmp.lt.s32.totalorder (!%p187_p2), %s406_s19, 3 }
   0x6   : > { %190 = sbr.rel (%p187_p2) target bundleno = 254 (0xfe), region = 40 }
   0xb   : > { %v465_v0 = vld [vmem:[%s575_s3 + $0x38] sm:$0xff]   ;;  %v483_v1 = vmov 0.0   ;;  %v466_v2 = vld [vmem:[%s575_s3 + $0x30] sm:$0xff]   ;;  %vm484_vm0 = vmmov 0   ;;  %v467_v3 = vld [vmem:[%s575_s3 + $0x28] sm:$0xff]   ;;  %s579_s19 = smov (!%p212_p3, %s406_s19), 3 }
   0xc   : > { %435 = vmatprep.subr.bf16.mxu0 %v483_v1  ;;  %451 = vmatprep.mubr.msk.bf16.mxu0 %vm484_vm0, %v483_v1  ;;  %v468_v4 = vld [vmem:[%s575_s3 + $0x20] sm:$0xff]   ;;  %s411_s28 = sshll.u32 %s579_s19, 3  ;;  %v469_v5 = vld [vmem:[%s575_s3 + $0x18] sm:$0xff]   ;;  %v470_v6 = vld [vmem:[%s575_s3 + $0x10] sm:$0xff]   ;;  %vm351_vm1 = vcmask 261120  }
   0xd   : > { %436 = vmatpush3.bf16.msra.mxu0 %v465_v0  ;;  %s215_s8 = scalar_lea.vmem %s572_s0, %s411_s28  ;;  %v413_v8 = vld [vmem:[%s573_s1] ss:$0 sm:$0xff]  ;;  %v471_v10 = vld [vmem:[%s575_s3 + $0x8] sm:$0xff]   ;;  %s219_s25 = scalar_lea.vmem %s577_s5, %s411_s28 }
   0xe   : > { %437 = vmatprep.subr.bf16.mxu0 %v483_v1  ;;  %v221_v7 = vld [vmem:[%s215_s8] sm:$0xff] }
   0xf   : > { %v229_v9 = vadd.f32 %v413_v8, %v221_v7  ;;  %v414_v11 = vld [vmem:[%s574_s2] ss:$0 sm:$0xff] }
  0x10   : > { %v472_v13 = vld [vmem:[%s575_s3] sm:$0xff]  }
  0x11   : > { %438 = vmatpush3.bf16.msra.mxu0 %v466_v2  ;;  %v237_v12 = vmul.f32 %v414_v11, %v229_v9  ;;  %v415_v15 = vld [vmem:[%s576_s4] ss:$0 sm:$0xff] }
  0x12   : > { %439 = vmatprep.subr.bf16.mxu0 %v483_v1 }
  0x13   : > { %v238_v14 = vpack.c.bf16 %v237_v12, %v237_v12 }
  0x15   : > { %440 = vmatpush3.bf16.msra.mxu0 %v467_v3 }
  0x16   : > { %441 = vmatprep.subr.bf16.mxu0 %v483_v1 }
  0x19   : > { %442 = vmatpush3.bf16.msra.mxu0 %v468_v4 }
  0x1a   : > { %443 = vmatprep.subr.bf16.mxu0 %v483_v1 }
  0x1d   : > { %444 = vmatpush3.bf16.msra.mxu0 %v469_v5 }
  0x1e   : > { %445 = vmatprep.subr.bf16.mxu0 %v483_v1 }
  0x21   : > { %446 = vmatpush3.bf16.msra.mxu0 %v470_v6 }
  0x22   : > { %447 = vmatprep.subr.bf16.mxu0 %v483_v1 }
  0x25   : > { %448 = vmatpush3.bf16.msra.mxu0 %v471_v10 }
  0x26   : > { %449 = vmatprep.subr.bf16.mxu0 %v483_v1 }
  0x29   : > { %450 = vmatpush3.bf16.msra.mxu0 %v472_v13 }
  0x2c   : > { %452 = vmatmul.mubr.bf16.vlgmr.msra.gmra.mxu0 %v238_v14 }
  0xec   : > { %v344_v16 = vpop.f32.mrf.mxu0 }
  0xed   : > { %v345_v17 = vadd.f32 %v415_v15, %v344_v16 }
  0xee   : > { %v453_v18 = vpop.f32.mrf.mxu0 }
  0xef   : > { %473 = vtanh.f32 %v345_v17 }
  0xf0   : > { %v347_v19 = vpop.f32.mrf.mxu0 }
  0xf2   : > { %v454_v20 = vpop.f32.mrf.mxu0 }
  0xfc   : > { %v474_v21 = vpop.eup %473 }
  0xfd   : > { %352 = vst.msk [vmem:[%s219_s25] sm:$0xff] %vm351_vm1, %v474_v21 }
  0xfe PF: > { %s15_s18 = sadd.s32 1, %s481_s18  }
  0xff   : > { %p12_p4 = scmp.ge.s32.totalorder %s15_s18, 6  }
 0x101   :  { %14 = sbr.rel (!%p12_p4) target bundleno = 1 (0x1), region = 70 }

// kernel: openunmix_mtl_forward.9
= control target key start
LH: loop header
LB: loop body
LE: loop exit
PB: predicated region body
PF: predicated region fallthrough
CT: control target
= control target key end

     0   :  { %s802_s30 = smov 0   ;;  %s855_s0 = inlined_call_operand.vmem [shape: f32[32,16], index: 0, kind: input, shape index: {}]   ;;  %s856_s1 = inlined_call_operand.vmem [shape: f32[32,16], index: 1, kind: input, shape index: {}]   ;;  %s857_s2 = inlined_call_operand.vmem [shape: bf16[16,64], index: 2, kind: input, shape index: {}]   ;;  %s858_s3 = inlined_call_operand.vmem [shape: bf16[16,64], index: 3, kind: input, shape index: {}]   ;;  %s859_s4 = inlined_call_operand.vmem [shape: f32[1,64], index: 4, kind: input, shape index: {}]   ;;  %s860_s5 = inlined_call_operand.vmem [shape: bf16[16,64], index: 5, kind: input, shape index: {}]   ;;  %s861_s6 = inlined_call_operand.vmem [shape: bf16[16,64], index: 6, kind: input, shape index: {}]   ;;  %s862_s7 = inlined_call_operand.vmem [shape: f32[1,64], index: 7, kind: input, shape index: {}]   ;;  %s863_s8 = inlined_call_operand.vmem [shape: f32[32,64], index: 8, kind: output, shape index: {0}]   ;;  %s864_s9 = inlined_call_operand.vmem [shape: f32[32,64], index: 9, kind: output, shape index: {1}]  }
   0x1 LB: > { %s675_s10 = sadd.s32 4294967295, %s748_s30   ;;  %p679_p0 = scmp.ge.s32.totalorder %s748_s30, 1  ;;  %s748_s30 = sphi %s802_s30, %s20_s30  }
   0x2   : > { %p298_p1 = scmp.lt.s32.totalorder %s748_s30, 5 }
   0x4   : > { %p299_p2 = pnand %p679_p0, %p298_p1 }
   0x5   : > { %p340_p3 = scmp.lt.s32.totalorder (!%p299_p2), %s675_s10, 3 }
   0x6   : > { %302 = sbr.rel (%p299_p2) target bundleno = 225 (0xe1), region = 52 }
   0xb   : > { %v738_v0 = vld [vmem:[%s858_s3] sm:$0xff]   ;;  %v750_v1 = vmov 0.0   ;;  %vm751_vm0 = vmmov 0   ;;  %s866_s10 = smov (!%p340_p3, %s675_s10), 3  ;;  %vm371_vm1 = vcmask 130048   ;;  %vm472_vm2 = vcmask 523264  }
   0xc   : > { %704 = vmatprep.subr.bf16.mxu0 %v750_v1  ;;  %710 = vmatprep.subr.bf16.mxu1 %v750_v1  ;;  %v739_v2 = vld [vmem:[%s857_s2] sm:$0xff]   ;;  %s818_s15 = sshll.u32 %s866_s10, 3 }
   0xd   : > { %705 = vmatpush3.bf16.msra.mxu0 %v738_v0  ;;  %706 = vmatprep.mubr.msk.bf16.mxu0 %vm751_vm0, %v750_v1  ;;  %s347_s18 = scalar_lea.vmem %s856_s1, %s818_s15  ;;  %s343_s21 = scalar_lea.vmem %s855_s0, %s818_s15  ;;  %v740_v3 = vld [vmem:[%s861_s6] sm:$0xff]  }
   0xe   : > { %711 = vmatpush3.bf16.msra.mxu1 %v739_v2  ;;  %712 = vmatprep.mubr.msk.bf16.mxu1 %vm751_vm0, %v750_v1  ;;  %v359_v4 = vld [vmem:[%s347_s18] sm:$0xff]  ;;  %s351_s10 = scalar_lea.vmem %s863_s8, %s818_s15  ;;  %s355_s16 = scalar_lea.vmem %s864_s9, %s818_s15 }
   0xf   : > { %716 = vmatprep.subr.bf16.mxu0 %v750_v1  ;;  %722 = vmatprep.subr.bf16.mxu1 %v750_v1  ;;  %v357_v5 = vld [vmem:[%s343_s21] sm:$0xff]  ;;  %v360_v7 = vpack.c.bf16 %v359_v4, %v359_v4 }
  0x10   : > { %v741_v6 = vld [vmem:[%s860_s5] sm:$0xff]   ;;  %v358_v8 = vpack.c.bf16 %v357_v5, %v357_v5 }
  0x11   : > { %707 = vmatmul.mubr.msk.bf16.vlgmr.msra.gmra.mxu0 %vm371_vm1, %v360_v7  ;;  %v688_v11 = vld [vmem:[%s859_s4] ss:$0 sm:$0xff] }
  0x12   : > { %713 = vmatmul.mubr.msk.bf16.vlgmr.msra.gmra.mxu1 %vm371_vm1, %v358_v8  ;;  %717 = vmatpush3.bf16.msra.mxu0 %v740_v3  ;;  %v693_v22 = vld [vmem:[%s862_s7] ss:$0 sm:$0xff] }
  0x13   : > { %723 = vmatpush3.bf16.msra.mxu1 %v741_v6  ;;  %718 = vmatprep.mubr.msk.bf16.mxu0 %vm751_vm0, %v750_v1 }
  0x14   : > { %724 = vmatprep.mubr.msk.bf16.mxu1 %vm751_vm0, %v750_v1 }
  0x19   : > { %719 = vmatmul.mubr.msk.bf16.vlgmr.msra.gmra.mxu0 %vm371_vm1, %v360_v7 }
  0x1a   : > { %725 = vmatmul.mubr.msk.bf16.vlgmr.msra.gmra.mxu1 %vm371_vm1, %v358_v8 }
  0xd1   : > { %v409_v9 = vpop.f32.mrf.mxu0 }
  0xd2   : > { %v458_v10 = vpop.f32.mrf.mxu1 }
  0xd3   : > { %v459_v12 = vadd.f32 %v458_v10, %v409_v9  ;;  %v708_v13 = vpop.f32.mrf.mxu0 }
  0xd4   : > { %v714_v14 = vpop.f32.mrf.mxu1 }
  0xd5   : > { %v471_v15 = vadd.f32 %v688_v11, %v459_v12  ;;  %v412_v16 = vpop.f32.mrf.mxu0 }
  0xd6   : > { %v461_v17 = vpop.f32.mrf.mxu1 }
  0xd7   : > { %473 = vst.msk [vmem:[%s351_s10] sm:$0xff] %vm472_vm2, %v471_v15  ;;  %v709_v18 = vpop.f32.mrf.mxu0 }
  0xd8   : > { %v715_v19 = vpop.f32.mrf.mxu1 }
  0xd9   : > { %v518_v20 = vpop.f32.mrf.mxu0 }
  0xda   : > { %v564_v21 = vpop.f32.mrf.mxu1 }
  0xdb   : > { %v565_v23 = vadd.f32 %v564_v21, %v518_v20  ;;  %v720_v24 = vpop.f32.mrf.mxu0 }
  0xdc   : > { %v726_v25 = vpop.f32.mrf.mxu1 }
  0xdd   : > { %v577_v26 = vadd.f32 %v693_v22, %v565_v23  ;;  %v521_v27 = vpop.f32.mrf.mxu0 }
  0xde   : > { %v567_v28 = vpop.f32.mrf.mxu1 }
  0xdf   : > { %578 = vst.msk [vmem:[%s355_s16] sm:$0xff] %vm472_vm2, %v577_v26  ;;  %v721_v29 = vpop.f32.mrf.mxu0 }
  0xe0   : > { %v727_v30 = vpop.f32.mrf.mxu1 }
  0xe1 PF: > { %s20_s30 = sadd.s32 1, %s748_s30  }
  0xe2   : > { %p17_p4 = scmp.ge.s32.totalorder %s20_s30, 6  }
  0xe4   :  { %19 = sbr.rel (!%p17_p4) target bundleno = 1 (0x1), region = 97 }

// kernel: openunmix_mtl_forward.15
= control target key start
LH: loop header
LB: loop body
LE: loop exit
PB: predicated region body
PF: predicated region fallthrough
CT: control target
= control target key end

     0   :  { %s1396_s26 = smov 0   ;;  %s1507_s0 = inlined_call_operand.vmem [shape: f32[32,32], index: 0, kind: input, shape index: {}]   ;;  %s1508_s1 = inlined_call_operand.vmem [shape: f32[32,16], index: 1, kind: input, shape index: {}]   ;;  %s1509_s2 = inlined_call_operand.vmem [shape: f32[32,16], index: 2, kind: input, shape index: {}]   ;;  %s1510_s3 = inlined_call_operand.vmem [shape: f32[32,128], index: 3, kind: input, shape index: {}]   ;;  %s1511_s4 = inlined_call_operand.vmem [shape: bf16[32,32], index: 4, kind: input, shape index: {}]   ;;  %s1512_s5 = inlined_call_operand.vmem [shape: bf16[16,32], index: 5, kind: input, shape index: {}]   ;;  %s1513_s6 = inlined_call_operand.vmem [shape: bf16[16,32], index: 6, kind: input, shape index: {}]   ;;  %s1514_s7 = inlined_call_operand.vmem [shape: f32[1,32], index: 7, kind: input, shape index: {}]   ;;  %s1515_s8 = inlined_call_operand.vmem [shape: bf16[32,128], index: 8, kind: input, shape index: {}]   ;;  %s1516_s9 = inlined_call_operand.vmem [shape: f32[1,128], index: 9, kind: input, shape index: {}]   ;;  %s1517_s10 = inlined_call_operand.vmem [shape: bf16[32,16], index: 10, kind: input, shape index: {}]   ;;  %s1518_s11 = inlined_call_operand.vmem [shape: bf16[16,16], index: 11, kind: input, shape index: {}]   ;;  %s1519_s12 = inlined_call_operand.vmem [shape: bf16[16,16], index: 12, kind: input, shape index: {}]   ;;  %s1520_s13 = inlined_call_operand.vmem [shape: f32[1,16], index: 13, kind: input, shape index: {}]   ;;  %s1521_s14 = inlined_call_operand.vmem [shape: f32[1,16], index: 14, kind: input, shape index: {}]   ;;  %s1522_s15 = inlined_call_operand.<no memory space> [shape: f32[1,1], index: 15, kind: input, shape index: {}]   ;;  %s1523_s16 = inlined_call_operand.vmem [shape: f32[32,128], index: 16, kind: output, shape index: {0}]   ;;  %s1524_s17 = inlined_call_operand.vmem [shape: f32[32,1], index: 17, kind: output, shape index: {1}]  }
   0x1   :  { %1525 = sst [smem:[#allocation3_spill]] %s1507_s0  ;;  %v23_v0 = vstv %s1522_s15 }
   0x2   :  { %1526 = sst [smem:[#allocation4_spill]] %s1508_s1  ;;  %24 = vst [vmem:[#allocation2] sm:$0x1] %v23_v0 }
   0x3 LB: > { %s1168_s27 = sadd.s32 4294967295, %s1299_s26   ;;  %p1172_p0 = scmp.ge.s32.totalorder %s1299_s26, 1  ;;  %s1299_s26 = sphi %s1396_s26, %s30_s26  }
   0x4   : > { %p518_p1 = scmp.lt.s32.totalorder %s1299_s26, 5 }
   0x6   : > { %p519_p2 = pnand %p1172_p0, %p518_p1 }
   0x7   : > { %p584_p3 = scmp.lt.s32.totalorder (!%p519_p2), %s1168_s27, 3  ;;  %s1527_s23 = sld [smem:[#allocation4_spill]] (!%p519_p2) }
   0x8   : > { %522 = sbr.rel (%p519_p2) target bundleno = 613 (0x265), region = 84  ;;  %s1528_s29 = sld [smem:[#allocation3_spill]] (!%p519_p2) }
   0xd   : > { %v1279_v1 = vld [vmem:[%s1511_s4 + $0x8] sm:$0xff]   ;;  %v1301_v2 = vmov 0.0   ;;  %v1280_v3 = vld [vmem:[%s1512_s5] sm:$0xff]   ;;  %vm1302_vm0 = vmmov 0   ;;  %s1530_s27 = smov (!%p584_p3, %s1168_s27), 3  ;;  %vm627_vm1 = vcmask 130048  }
   0xe   : > { %1227 = vmatprep.subr.bf16.mxu1 %v1301_v2  ;;  %1221 = vmatprep.subr.bf16.mxu0 %v1301_v2  ;;  %v1281_v4 = vld [vmem:[%s1511_s4] sm:$0xff]   ;;  %s1421_s19 = sshll.u32 %s1530_s27, 3  ;;  %vm683_vm2 = vcmask 261120   ;;  %v1283_v12 = vld [vmem:[%s1515_s8 + $0x8] sm:$0xff]   ;;  %vm1046_vm3 = vcmask 7168  }
   0xf   : > { %1228 = vmatpush3.bf16.msra.mxu1 %v1279_v1  ;;  %1223 = vmatprep.mubr.msk.bf16.mxu0 %vm1302_vm0, %v1301_v2  ;;  %v1282_v5 = vld [vmem:[%s1513_s6] sm:$0xff]   ;;  %s591_s24 = scalar_lea.vmem %s1527_s23, %s1421_s19  ;;  %s587_s27 = scalar_lea.vmem %s1528_s29, %s1421_s19  ;;  %v1286_v33 = vld [vmem:[%s1517_s10 + $0x8] sm:$0xff]  }
  0x10   : > { %1222 = vmatpush3.bf16.msra.mxu0 %v1280_v3  ;;  %1229 = vmatprep.subr.bf16.mxu1 %v1301_v2  ;;  %v611_v6 = vld [vmem:[%s591_s24] sm:$0xff]  ;;  %s595_s30 = scalar_lea.vmem %s1509_s2, %s1421_s19  ;;  %s599_s22 = scalar_lea.vmem %s1510_s3, %s1421_s19 }
  0x11   : > { %1235 = vmatprep.subr.bf16.mxu0 %v1301_v2  ;;  %1231 = vmatprep.mubr.msk.bf16.mxu1 %vm1302_vm0, %v1301_v2  ;;  %v612_v7 = vpack.c.bf16 %v611_v6, %v611_v6  ;;  %v609_v8 = vld [vmem:[%s587_s27] sm:$0xff]  ;;  %s603_s25 = scalar_lea.vmem %s1523_s16, %s1421_s19  ;;  %s607_s18 = scalar_lea.vmem %s1524_s17, %s1421_s19 }
  0x12   : > { %v610_v9 = vpack.c.bf16 %v609_v8, %v609_v8  ;;  %v613_v10 = vld [vmem:[%s595_s30] sm:$0xff] }
  0x13   : > { %1230 = vmatpush3.bf16.msra.mxu1 %v1281_v4  ;;  %1224 = vmatmul.mubr.msk.bf16.vlgmr.msra.gmra.mxu0 %vm627_vm1, %v612_v7  ;;  %v614_v11 = vpack.c.bf16 %v613_v10, %v613_v10  ;;  %v1284_v13 = vld [vmem:[%s1518_s11] sm:$0xff]  }
  0x14   : > { %1241 = vmatprep.subr.bf16.mxu1 %v1301_v2  ;;  %1236 = vmatpush3.bf16.msra.mxu0 %v1282_v5  ;;  %v1285_v14 = vld [vmem:[%s1515_s8] sm:$0xff]  }
  0x15   : > { %1237 = vmatprep.mubr.msk.bf16.mxu0 %vm1302_vm0, %v1301_v2  ;;  %1249 = vmatprep.subr.bf16.mxu0 %v1301_v2  ;;  %v1287_v15 = vld [vmem:[%s1519_s12] sm:$0xff]  }
  0x16   : > { %1232 = vmatmul.mubr.msk.bf16.vlgmr.msra.gmra.mxu1 %vm683_vm2, %v610_v9  ;;  %v1186_v26 = vld [vmem:[%s1514_s7] ss:$0 sm:$0xff] }
  0x17   : > { %1245 = vmatprep.mubr.msk.bf16.mxu1 %vm1302_vm0, %v1301_v2  ;;  %1242 = vmatpush3.bf16.msra.mxu1 %v1283_v12  ;;  %v1288_v35 = vld [vmem:[%s1517_s10] sm:$0xff]  }
  0x18   : > { %1243 = vmatprep.subr.bf16.mxu1 %v1301_v2  ;;  %v1187_v44 = vld [vmem:[%s1516_s9] ss:$0 sm:$0xff] }
  0x19   : > { %v856_v47 = vld [vmem:[%s599_s22] sm:$0xff] }
  0x1a   : > { %v1198_v56 = vld [vmem:[%s1520_s13] ss:$0 sm:$0xff] }
  0x1b   : > { %1238 = vmatmul.mubr.msk.bf16.vlgmr.msra.gmra.mxu0 %vm627_vm1, %v614_v11  ;;  %1244 = vmatpush3.bf16.msra.mxu1 %v1285_v14  ;;  %v1199_v61 = vld [vmem:[%s1521_s14] ss:$0 sm:$0xff] }
  0x1c   : > { %1251 = vmatprep.mubr.msk.bf16.mxu0 %vm1302_vm0, %v1301_v2  ;;  %1250 = vmatpush3.bf16.msra.mxu0 %v1284_v13  ;;  %v1200_v1 = vld [vmem:[#allocation2] ss:$0 sm:$0xff] }
  0x1d   : > { %1263 = vmatprep.subr.bf16.mxu0 %v1301_v2  ;;  %1255 = vmatprep.subr.bf16.mxu1 %v1301_v2 }
  0x23   : > { %1252 = vmatmul.mubr.msk.bf16.vlgmr.msra.gmra.mxu0 %vm627_vm1, %v612_v7 }
  0x24   : > { %1265 = vmatprep.mubr.msk.bf16.mxu0 %vm1302_vm0, %v1301_v2  ;;  %1264 = vmatpush3.bf16.msra.mxu0 %v1287_v15 }
  0x2b   : > { %1266 = vmatmul.mubr.msk.bf16.vlgmr.msra.gmra.mxu0 %vm627_vm1, %v614_v11 }
  0xd3   : > { %v665_v16 = vpop.f32.mrf.mxu0 }
  0xd5   : > { %v1225_v18 = vpop.f32.mrf.mxu0 }
  0xd6   : > { %v721_v17 = vpop.f32.mrf.mxu1 }
  0xd7   : > { %v668_v20 = vpop.f32.mrf.mxu0  ;;  %v722_v23 = vadd.f32 %v721_v17, %v665_v16 }
  0xd8   : > { %v1233_v19 = vpop.f32.mrf.mxu1 }
  0xd9   : > { %v1226_v22 = vpop.f32.mrf.mxu0 }
  0xda   : > { %v724_v21 = vpop.f32.mrf.mxu1 }
  0xdb   : > { %v772_v25 = vpop.f32.mrf.mxu0 }
  0xdc   : > { %v1234_v24 = vpop.f32.mrf.mxu1  ;;  %v778_v27 = vadd.f32 %v772_v25, %v722_v23 }
  0xdd   : > { %v1239_v28 = vpop.f32.mrf.mxu0 }
  0xde   : > { %v786_v29 = vadd.f32 %v1186_v26, %v778_v27 }
  0xdf   : > { %v775_v30 = vpop.f32.mrf.mxu0 }
  0xe0   : > { %v787_v31 = vmax.f32 %v786_v29, 0.0 }
  0xe1   : > { %v1240_v32 = vpop.f32.mrf.mxu0 }
  0xe2   : > { %v788_v34 = vpack.c.bf16 %v787_v31, %v787_v31 }
  0xe3   : > { %v905_v36 = vpop.f32.mrf.mxu0 }
  0xe4   : > { %1246 = vmatmul.mubr.msk.bf16.vlgmr.msra.gmra.mxu1 %vm683_vm2, %v788_v34 }
  0xe5   : > { %1256 = vmatpush3.bf16.msra.mxu1 %v1286_v33  ;;  %1259 = vmatprep.mubr.msk.bf16.mxu1 %vm1302_vm0, %v1301_v2  ;;  %v1253_v37 = vpop.f32.mrf.mxu0 }
  0xe6   : > { %1257 = vmatprep.subr.bf16.mxu1 %v1301_v2 }
  0xe7   : > { %v908_v38 = vpop.f32.mrf.mxu0 }
  0xe9   : > { %1258 = vmatpush3.bf16.msra.mxu1 %v1288_v35  ;;  %v1254_v39 = vpop.f32.mrf.mxu0 }
  0xeb   : > { %v1005_v40 = vpop.f32.mrf.mxu0 }
  0xec   : > { %1260 = vmatmul.mubr.msk.bf16.vlgmr.msra.gmra.mxu1 %vm683_vm2, %v610_v9 }
  0xed   : > { %v1267_v41 = vpop.f32.mrf.mxu0 }
  0xef   : > { %v1008_v42 = vpop.f32.mrf.mxu0 }
  0xf1   : > { %v1268_v43 = vpop.f32.mrf.mxu0 }
 0x1a4   : > { %v849_v45 = vpop.f32.mrf.mxu1 }
 0x1a5   : > { %v850_v46 = vadd.f32 %v1187_v44, %v849_v45 }
 0x1a6   : > { %v1247_v48 = vpop.f32.mrf.mxu1 }
 0x1a7   : > { %v855_v49 = vmax.f32 %v850_v46, 0.0 }
 0x1a8   : > { %v852_v50 = vpop.f32.mrf.mxu1 }
 0x1a9   : > { %v857_v51 = vmul.f32 %v856_v47, %v855_v49 }
 0x1aa   : > { %v1248_v52 = vpop.f32.mrf.mxu1 }
 0x1ab   : > { %858 = vst [vmem:[%s603_s25] sm:$0xff] %v857_v51 }
 0x1ac   : > { %v957_v53 = vpop.f32.mrf.mxu1 }
 0x1ad   : > { %v958_v54 = vadd.f32 %v957_v53, %v905_v36 }
 0x1ae   : > { %v1261_v55 = vpop.f32.mrf.mxu1 }
 0x1af   : > { %v1011_v57 = vadd.f32 %v1005_v40, %v958_v54 }
 0x1b0   : > { %v960_v58 = vpop.f32.mrf.mxu1 }
 0x1b1   : > { %v1019_v59 = vadd.f32 %v1198_v56, %v1011_v57 }
 0x1b2   : > { %v1262_v60 = vpop.f32.mrf.mxu1 }
 0x1b3   : > { %v1020_v62 = vmax.f32 %v1019_v59, 0.0 }
 0x1b5   : > { %v1028_v63 = vmul.f32 %v1199_v61, %v1020_v62 }
 0x1b7   : > { %v1029_v0 = vsel %vm627_vm1, %v1028_v63, 0.0 }
 0x1b8   : > { %1030 = vadd.xlane.f32.xlu0 %v1029_v0 }
 0x241   : > { %v1031_v2 = vpop.xlane.xlu0 %1030 }
 0x242   : > { %v1039_v3 = vadd.f32 %v1200_v1, %v1031_v2 }
 0x244   : > { %v1201_v4 = vmul.f32 -1.442695, %v1039_v3 }
 0x246   : > { %1289 = vpow2.f32 %v1201_v4 }
 0x253   : > { %v1290_v5 = vpop.eup %1289 }
 0x254   : > { %v1043_v6 = vadd.f32 1.0, %v1290_v5 }
 0x256   : > { %1291 = vrcp.f32 %v1043_v6 }
 0x263   : > { %v1292_v7 = vpop.eup %1291 }
 0x264   : > { %1047 = vst.msk [vmem:[%s607_s18] sm:$0xff] %vm1046_vm3, %v1292_v7 }
 0x265 PF: > { %s30_s26 = sadd.s32 1, %s1299_s26  }
 0x266   : > { %p27_p4 = scmp.ge.s32.totalorder %s30_s26, 6  }
 0x268   :  { %29 = sbr.rel (!%p27_p4) target bundleno = 3 (0x3), region = 135 }

</bundles_post_ra>
